<compile_context>
chip_gen: v7x
topology: tpu7x:2x2x1
jax: 0.10.0
libtpu: 0.0.40
codegen_flags: <defaults>
</compile_context>

<pallas_src>
import functools

import jax
import jax.numpy as jnp
from jax.experimental import pallas as pl
from jax.experimental.pallas import tpu as pltpu


def _round_up(x, m):
    return (x + m - 1) // m * m


def _layernorm(x, g, b, eps=1e-5):
    mu = jnp.mean(x, axis=-1, keepdims=True)
    var = jnp.mean((x - mu) ** 2, axis=-1, keepdims=True)
    return (x - mu) * jax.lax.rsqrt(var + eps) * g + b


# ----------------------------------------------------------------------------
# Weight-slab layout: every block starts at lane 0 of its own 8-aligned row range.
# ----------------------------------------------------------------------------
_W_BLOCKS = ("wuv", "wp", "wab", "wc", "wmsg", "wagg", "wf1", "wf2",
             "rsel2", "repA", "repB", "repBT")


def _slab_layout(n, hidden, rep, H):
    sizes = dict(wuv=hidden, wp=rep, wab=rep, wc=rep, wmsg=rep, wagg=rep,
                 wf1=hidden, wf2=4 * hidden, rsel2=2 * H,
                 repA=n * n, repB=n * n, repBT=n)
    offs, r = {}, 0
    for name in _W_BLOCKS:
        offs[name] = r
        r += _round_up(sizes[name], 8)
    return offs, _round_up(r, 8)


# ----------------------------------------------------------------------------
# Fused multi-layer Pallas kernel.
# ----------------------------------------------------------------------------
def make_hof_forward(n, hidden, rep, H, num_layers):
    n2 = n * n
    offs, w_rows = _slab_layout(n, hidden, rep, H)
    wcols = _round_up(max(2 * rep, 4 * hidden, rep, n2, 4 * H), 128)
    bcols = _round_up(max(2 * rep, 4 * hidden, rep), 128)
    b_rows = 16
    f32 = jnp.float32

    def kernel(app_ref, spat_ref, w_ref, b_ref, out_ref):
        layer = pl.program_id(0)

        @pl.when(layer == 0)
        def _():
            out_ref[...] = app_ref[...]        # first layer consumes the module input

        app = out_ref[...]                      # (n, hidden), carried across layers

        def W(name, rows, cols):
            r0 = offs[name]
            return w_ref[r0:r0 + rows, 0:cols]

        def B(i, cols):
            return b_ref[i:i + 1, 0:cols]

        dot = functools.partial(jnp.dot, preferred_element_type=f32)

        # ---- Kappe / Vappe: unary & unary2 fused into one 128-lane matmul ----
        kv = jnp.maximum(dot(app, W("wuv", hidden, 2 * rep)) + B(0, 2 * rep), 0.0)
        ka = kv[:, :rep]                        # relu(unary(appearance))
        va = kv[:, rep:]                        # relu(unary2(appearance))

        # ---- per-head attn-logit contributions of Kappe (block-diag packed) ----
        # columns: [A1 | A2 | B1 | B2]; attn1/attn2 biases folded into B columns.
        klog = dot(ka, W("wab", rep, 4 * H)) + B(2, 4 * H)            # (n, 4H)

        # ---- pairwise() over all n*n sender/receiver pairs in one matmul ----
        spat2d = spat_ref[...]                                         # (n*n, rep)
        q = jnp.maximum(dot(spat2d, W("wp", rep, rep)) + B(1, rep), 0.0)
        qc = dot(q, W("wc", rep, 2 * H))                               # (n*n, [C1|C2])

        # ---- attention weights: sigmoid(A[a] + B[b] + C[ab] + bias), averaged
        #      over attn1/attn2 and broadcast to each head's sub-block (one matmul)
        rep_a = W("repA", n2, n)        # row a*n+b -> one-hot(sender a)
        rep_b = W("repB", n2, n)        # row a*n+b -> one-hot(receiver b)
        lg = dot(rep_a, klog[:, 0:2 * H]) + dot(rep_b, klog[:, 2 * H:4 * H]) + qc
        w_full = dot(jax.nn.sigmoid(lg), W("rsel2", 2 * H, rep))       # (n*n, rep)

        # ---- messages: (Vappe[a] * Qspat[a,b]) through block-diag per-head linear
        mess = dot(rep_a, va) * q                                      # (n*n, rep)
        msg = dot(mess, W("wmsg", rep, rep)) + B(3, rep)

        # ---- weighted sum over the sender axis a (single matmul with repB^T) ----
        acc = dot(W("repBT", n, n2), w_full * msg)                     # (n, rep)

        agg = dot(jnp.maximum(acc, 0.0), W("wagg", rep, hidden)) + B(4, hidden)
        x = _layernorm(app + agg, B(5, hidden), B(6, hidden))

        # ---- FeedForwardNetwork: norm(x + fc2(relu(fc1(x)))) ----
        h1 = jnp.maximum(dot(x, W("wf1", hidden, 4 * hidden)) + B(7, 4 * hidden), 0.0)
        y = dot(h1, W("wf2", 4 * hidden, hidden)) + B(8, hidden)
        out_ref[...] = _layernorm(x + y, B(9, hidden), B(10, hidden))

    def forward(appearance, spatial2d, wslabs, bslabs):
        return pl.pallas_call(
            kernel,
            out_shape=jax.ShapeDtypeStruct((n, hidden), f32),
            grid=(num_layers,),
            in_specs=[
                pl.BlockSpec((n, hidden), lambda l: (0, 0)),        # DMA'd once
                pl.BlockSpec((n2, rep), lambda l: (0, 0)),          # DMA'd once
                pl.BlockSpec((None, w_rows, wcols), lambda l: (l, 0, 0)),
                pl.BlockSpec((None, b_rows, bcols), lambda l: (l, 0, 0)),
            ],
            out_specs=pl.BlockSpec((n, hidden), lambda l: (0, 0)),  # resident carry
            compiler_params=pltpu.CompilerParams(
                dimension_semantics=("arbitrary",)),
        )(appearance, spatial2d, wslabs, bslabs)

    return forward, offs, w_rows, wcols, b_rows, bcols


# ----------------------------------------------------------------------------
# Parameter init (deterministic, synthetic) + packing into the two slabs.
# ----------------------------------------------------------------------------
def init_layer_params(key, hidden, rep, H):
    sub = rep // H
    ks = jax.random.split(key, 18)

    def w(k, fan_in, shape):
        return jax.random.normal(k, shape, jnp.float32) / jnp.sqrt(float(fan_in))

    return dict(
        wu=w(ks[0], hidden, (hidden, rep)),
        bu=0.02 * jax.random.normal(ks[1], (rep,), jnp.float32),
        wu2=w(ks[2], hidden, (hidden, rep)),
        bu2=0.02 * jax.random.normal(ks[3], (rep,), jnp.float32),
        wp=w(ks[4], rep, (rep, rep)),
        bp=0.02 * jax.random.normal(ks[5], (rep,), jnp.float32),
        attn1_w=w(ks[6], 3 * sub, (H, 3 * sub)),
        attn1_b=0.02 * jax.random.normal(ks[7], (H,), jnp.float32),
        attn2_w=w(ks[8], 3 * sub, (H, 3 * sub)),
        attn2_b=0.02 * jax.random.normal(ks[9], (H,), jnp.float32),
        msg_w_t=w(ks[10], sub, (H, sub, sub)),            # (head, in, out)
        msg_b=0.02 * jax.random.normal(ks[11], (H, sub), jnp.float32),
        wagg=w(ks[12], rep, (rep, hidden)),
        bagg=0.02 * jax.random.normal(ks[13], (hidden,), jnp.float32),
        g1=jnp.ones((hidden,), jnp.float32), b1=jnp.zeros((hidden,), jnp.float32),
        wf1=w(ks[14], hidden, (hidden, 4 * hidden)),
        bf1=0.02 * jax.random.normal(ks[15], (4 * hidden,), jnp.float32),
        wf2=w(ks[16], 4 * hidden, (4 * hidden, hidden)),
        bf2=0.02 * jax.random.normal(ks[17], (hidden,), jnp.float32),
        g2=jnp.ones((hidden,), jnp.float32), b2=jnp.zeros((hidden,), jnp.float32),
    )


def pack_layer_slabs(p, n, hidden, rep, H, offs, w_rows, wcols, b_rows, bcols):
    sub = rep // H
    eye_h = jnp.eye(H, dtype=jnp.float32)
    eye_n = jnp.eye(n, dtype=jnp.float32)

    def head_proj(ws):  # (H, sub) -> (rep, H) block-diagonal column projector
        return (ws[:, :, None] * eye_h[:, None, :]).reshape(rep, H)

    wA1 = head_proj(p['attn1_w'][:, :sub])
    wB1 = head_proj(p['attn1_w'][:, sub:2 * sub])
    wC1 = head_proj(p['attn1_w'][:, 2 * sub:])
    wA2 = head_proj(p['attn2_w'][:, :sub])
    wB2 = head_proj(p['attn2_w'][:, sub:2 * sub])
    wC2 = head_proj(p['attn2_w'][:, 2 * sub:])
    # block-diagonal per-head message weight (rep, rep)
    wmsg = (p['msg_w_t'][:, :, None, :] * eye_h[:, None, :, None]).reshape(rep, rep)
    # head -> sub-block broadcast fused with the (w1 + w2)/2 average: (2H, rep)
    rsel = jnp.repeat(eye_h, sub, axis=1)
    rsel2 = 0.5 * jnp.concatenate([rsel, rsel], axis=0)
    # sender / receiver selector matrices for the flattened (a*n + b) pair axis
    repA = jnp.repeat(eye_n, n, axis=0)      # row a*n+b -> one-hot(a)
    repB = jnp.tile(eye_n, (n, 1))           # row a*n+b -> one-hot(b)

    blocks = dict(
        wuv=jnp.concatenate([p['wu'], p['wu2']], axis=1),
        wp=p['wp'],
        wab=jnp.concatenate([wA1, wA2, wB1, wB2], axis=1),
        wc=jnp.concatenate([wC1, wC2], axis=1),
        wmsg=wmsg,
        wagg=p['wagg'],
        wf1=p['wf1'],
        wf2=p['wf2'],
        rsel2=rsel2,
        repA=repA,
        repB=repB,
        repBT=repB.T,
    )
    wslab = jnp.zeros((w_rows, wcols), jnp.float32)
    for name, blk in blocks.items():
        r0 = offs[name]
        wslab = wslab.at[r0:r0 + blk.shape[0], 0:blk.shape[1]].set(blk)

    zero_h = jnp.zeros((H,), jnp.float32)
    bias_rows = [
        jnp.concatenate([p['bu'], p['bu2']]),                            # 0 unary/unary2
        p['bp'],                                                         # 1 pairwise
        jnp.concatenate([zero_h, zero_h, p['attn1_b'], p['attn2_b']]),   # 2 attn (B cols)
        p['msg_b'].reshape(-1),                                          # 3 message
        p['bagg'],                                                       # 4 aggregate
        p['g1'], p['b1'],                                                # 5,6 LayerNorm 1
        p['bf1'],                                                        # 7 ffn fc1
        p['bf2'],                                                        # 8 ffn fc2
        p['g2'], p['b2'],                                                # 9,10 LayerNorm 2
    ]
    bslab = jnp.zeros((b_rows, bcols), jnp.float32)
    for i, row in enumerate(bias_rows):
        bslab = bslab.at[i, 0:row.shape[0]].set(row)
    return wslab, bslab


# ----------------------------------------------------------------------------
# Pure-JAX reference (per-head formulation mirroring the PyTorch module).
# ----------------------------------------------------------------------------
def ref_layer(app, spat, p, H, sub):
    relu = jax.nn.relu
    n = app.shape[0]
    Qs = relu(jnp.einsum('abr,rs->abs', spat, p['wp']) + p['bp'])     # (n, n, rep)
    Ka = relu(app @ p['wu'] + p['bu'])
    Va = relu(app @ p['wu2'] + p['bu2'])
    Ka_h = Ka.reshape(n, H, sub)
    Va_h = Va.reshape(n, H, sub)
    Qs_h = Qs.reshape(n, n, H, sub)
    attn_map = []
    for h in range(H):
        feat = jnp.concatenate([
            jnp.broadcast_to(Ka_h[:, None, h, :], (n, n, sub)),
            jnp.broadcast_to(Ka_h[None, :, h, :], (n, n, sub)),
            Qs_h[:, :, h, :],
        ], axis=-1)
        w1 = jax.nn.sigmoid(feat @ p['attn1_w'][h] + p['attn1_b'][h])
        w2 = jax.nn.sigmoid(feat @ p['attn2_w'][h] + p['attn2_b'][h])
        wgt = 0.5 * (w1 + w2)
        mess = Va_h[:, None, h, :] * Qs_h[:, :, h, :]
        msg = mess @ p['msg_w_t'][h] + p['msg_b'][h]
        attn_map.append(jnp.sum(wgt[:, :, None] * msg, axis=0))
    agg = relu(jnp.concatenate(attn_map, axis=-1))
    agg = agg @ p['wagg'] + p['bagg']
    x = _layernorm(app + agg, p['g1'], p['b1'])
    hdd = relu(x @ p['wf1'] + p['bf1'])
    y = hdd @ p['wf2'] + p['bf2']
    return _layernorm(x + y, p['g2'], p['b2'])


# ----------------------------------------------------------------------------
if __name__ == "__main__":
    n, hidden, rep, H, num_layers = 8, 32, 64, 8, 2
    sub = rep // H

    key = jax.random.PRNGKey(0)
    k_app, k_spat, k_p = jax.random.split(key, 3)
    appearance = jax.random.normal(k_app, (n, hidden), jnp.float32)
    spatial = jax.random.normal(k_spat, (n, n, rep), jnp.float32)

    layer_params = [init_layer_params(k, hidden, rep, H)
                    for k in jax.random.split(k_p, num_layers)]

    forward, offs, w_rows, wcols, b_rows, bcols = make_hof_forward(
        n, hidden, rep, H, num_layers)

    slabs = [pack_layer_slabs(p, n, hidden, rep, H, offs, w_rows, wcols,
                              b_rows, bcols) for p in layer_params]
    wslabs = jnp.stack([w for w, _ in slabs])       # (L, w_rows, 128) weight slab
    bslabs = jnp.stack([b for _, b in slabs])       # (L, 16, 128) bias slab
    spatial2d = spatial.reshape(n * n, rep)         # free host-side reshape

    out = jax.jit(forward)(appearance, spatial2d, wslabs, bslabs)
    out = jax.block_until_ready(out)

    # correctness check against a pure-JAX per-head reference of the same math
    # (default matmul precision on both sides -> modest tolerance)
    ref = appearance
    for p in layer_params:
        ref = ref_layer(ref, spatial, p, H, sub)
    err = float(jnp.max(jnp.abs(out - ref)))
    assert jnp.allclose(out, ref, atol=2e-2, rtol=2e-2), f"max abs err {err}"
    print("KERNEL_OK")
</pallas_src>

<mosaic_0001>
module attributes {stable_mosaic.version = 11 : i64} {
  func.func @kernel(%arg0: i32, %arg1: memref<8x32xf32, #tpu.memory_space<vmem>>, %arg2: memref<64x64xf32, #tpu.memory_space<vmem>>, %arg3: memref<1x664x128xf32, #tpu.memory_space<vmem>>, %arg4: memref<1x16x128xf32, #tpu.memory_space<vmem>>, %arg5: memref<8x32xf32, #tpu.memory_space<vmem>>) attributes {dimension_semantics = [#tpu.dimension_semantics<arbitrary>], iteration_bounds = array<i64: 2>, scalar_prefetch = 0 : i64, scratch_operands = 0 : i64, tpu.core_type = #tpu.core_type<tc>, window_params = [{pipeline_mode = #tpu.pipeline_mode<synchronous>, transform_indices = @transform_0, window_bounds = array<i64: 8, 32>}, {pipeline_mode = #tpu.pipeline_mode<synchronous>, transform_indices = @transform_1, window_bounds = array<i64: 64, 64>}, {transform_indices = @transform_2, window_bounds = array<i64: 1, 664, 128>}, {transform_indices = @transform_3, window_bounds = array<i64: 1, 16, 128>}, {pipeline_mode = #tpu.pipeline_mode<synchronous>, transform_indices = @transform_4, window_bounds = array<i64: 8, 32>}]} {
    %c0_i32 = arith.constant 0 : i32
    %0 = arith.cmpi eq, %arg0, %c0_i32 : i32
    %1 = arith.extui %0 : i1 to i32
    %c0_i32_0 = arith.constant 0 : i32
    %2 = arith.cmpi ne, %1, %c0_i32_0 : i32
    scf.if %2 {
      %c0_81 = arith.constant 0 : index
      %c0_82 = arith.constant 0 : index
      %146 = vector.load %arg1[%c0_81, %c0_82] : memref<8x32xf32, #tpu.memory_space<vmem>>, vector<8x32xf32>
      %c0_83 = arith.constant 0 : index
      %c0_84 = arith.constant 0 : index
      %147 = vector.load %arg5[%c0_83, %c0_84] : memref<8x32xf32, #tpu.memory_space<vmem>>, vector<8x32xf32>
      tpu.vector_store %arg5[%c0_83, %c0_84], %146 {strides = array<i32>} : memref<8x32xf32, #tpu.memory_space<vmem>>, vector<8x32xf32>,
    } else {
    }
    %c0 = arith.constant 0 : index
    %c0_1 = arith.constant 0 : index
    %3 = vector.load %arg5[%c0, %c0_1] : memref<8x32xf32, #tpu.memory_space<vmem>>, vector<8x32xf32>
    %c0_2 = arith.constant 0 : index
    %c0_3 = arith.constant 0 : index
    %c0_4 = arith.constant 0 : index
    %4 = vector.load %arg3[%c0_2, %c0_3, %c0_4] : memref<1x664x128xf32, #tpu.memory_space<vmem>>, vector<1x32x128xf32>
    %5 = vector.shape_cast %4 : vector<1x32x128xf32> to vector<32x128xf32>
    %cst = arith.constant dense<0.000000e+00> : vector<8x128xf32>
    %6 = tpu.matmul %3, %5, %cst {dimension_numbers = #tpu.dot_dimension_numbers<[1], [0], [0], [1], [0, 0, 1, 1], [], []>} : vector<8x32xf32>, vector<32x128xf32>, vector<8x128xf32> -> vector<8x128xf32>
    %c0_5 = arith.constant 0 : index
    %c0_6 = arith.constant 0 : index
    %c0_7 = arith.constant 0 : index
    %7 = vector.load %arg4[%c0_5, %c0_6, %c0_7] : memref<1x16x128xf32, #tpu.memory_space<vmem>>, vector<1x1x128xf32>
    %8 = vector.shape_cast %7 : vector<1x1x128xf32> to vector<1x128xf32>
    %9 = vector.broadcast %8 : vector<1x128xf32> to vector<8x128xf32>
    %10 = arith.addf %6, %9 : vector<8x128xf32>
    %cst_8 = arith.constant 0.000000e+00 : f32
    %11 = vector.broadcast %cst_8 : f32 to vector<8x128xf32>
    %12 = arith.maximumf %10, %11 : vector<8x128xf32>
    %13 = vector.extract_strided_slice %12 {offsets = [0, 0], sizes = [8, 64], strides = [1, 1]} : vector<8x128xf32> to vector<8x64xf32>
    %14 = vector.extract_strided_slice %12 {offsets = [0, 64], sizes = [8, 64], strides = [1, 1]} : vector<8x128xf32> to vector<8x64xf32>
    %c0_9 = arith.constant 0 : index
    %c96 = arith.constant 96 : index
    %c0_10 = arith.constant 0 : index
    %15 = vector.load %arg3[%c0_9, %c96, %c0_10] : memref<1x664x128xf32, #tpu.memory_space<vmem>>, vector<1x64x32xf32>
    %16 = vector.shape_cast %15 : vector<1x64x32xf32> to vector<64x32xf32>
    %cst_11 = arith.constant dense<0.000000e+00> : vector<8x32xf32>
    %17 = tpu.matmul %13, %16, %cst_11 {dimension_numbers = #tpu.dot_dimension_numbers<[1], [0], [0], [1], [0, 0, 1, 1], [], []>} : vector<8x64xf32>, vector<64x32xf32>, vector<8x32xf32> -> vector<8x32xf32>
    %c0_12 = arith.constant 0 : index
    %c2 = arith.constant 2 : index
    %c0_13 = arith.constant 0 : index
    %18 = vector.load %arg4[%c0_12, %c2, %c0_13] : memref<1x16x128xf32, #tpu.memory_space<vmem>>, vector<1x1x32xf32>
    %19 = vector.shape_cast %18 : vector<1x1x32xf32> to vector<1x32xf32>
    %20 = vector.broadcast %19 : vector<1x32xf32> to vector<8x32xf32>
    %21 = arith.addf %17, %20 : vector<8x32xf32>
    %c0_14 = arith.constant 0 : index
    %c0_15 = arith.constant 0 : index
    %22 = vector.load %arg2[%c0_14, %c0_15] : memref<64x64xf32, #tpu.memory_space<vmem>>, vector<64x64xf32>
    %c0_16 = arith.constant 0 : index
    %c32 = arith.constant 32 : index
    %c0_17 = arith.constant 0 : index
    %23 = vector.load %arg3[%c0_16, %c32, %c0_17] : memref<1x664x128xf32, #tpu.memory_space<vmem>>, vector<1x64x64xf32>
    %24 = vector.shape_cast %23 : vector<1x64x64xf32> to vector<64x64xf32>
    %cst_18 = arith.constant dense<0.000000e+00> : vector<64x64xf32>
    %25 = tpu.matmul %22, %24, %cst_18 {dimension_numbers = #tpu.dot_dimension_numbers<[1], [0], [0], [1], [0, 0, 1, 1], [], []>} : vector<64x64xf32>, vector<64x64xf32>, vector<64x64xf32> -> vector<64x64xf32>
    %c0_19 = arith.constant 0 : index
    %c1 = arith.constant 1 : index
    %c0_20 = arith.constant 0 : index
    %26 = vector.load %arg4[%c0_19, %c1, %c0_20] : memref<1x16x128xf32, #tpu.memory_space<vmem>>, vector<1x1x64xf32>
    %27 = vector.shape_cast %26 : vector<1x1x64xf32> to vector<1x64xf32>
    %28 = vector.broadcast %27 : vector<1x64xf32> to vector<64x64xf32>
    %29 = arith.addf %25, %28 : vector<64x64xf32>
    %cst_21 = arith.constant 0.000000e+00 : f32
    %30 = vector.broadcast %cst_21 : f32 to vector<64x64xf32>
    %31 = arith.maximumf %29, %30 : vector<64x64xf32>
    %c0_22 = arith.constant 0 : index
    %c160 = arith.constant 160 : index
    %c0_23 = arith.constant 0 : index
    %32 = vector.load %arg3[%c0_22, %c160, %c0_23] : memref<1x664x128xf32, #tpu.memory_space<vmem>>, vector<1x64x16xf32>
    %33 = vector.shape_cast %32 : vector<1x64x16xf32> to vector<64x16xf32>
    %cst_24 = arith.constant dense<0.000000e+00> : vector<64x16xf32>
    %34 = tpu.matmul %31, %33, %cst_24 {dimension_numbers = #tpu.dot_dimension_numbers<[1], [0], [0], [1], [0, 0, 1, 1], [], []>} : vector<64x64xf32>, vector<64x16xf32>, vector<64x16xf32> -> vector<64x16xf32>
    %c0_25 = arith.constant 0 : index
    %c528 = arith.constant 528 : index
    %c0_26 = arith.constant 0 : index
    %35 = vector.load %arg3[%c0_25, %c528, %c0_26] : memref<1x664x128xf32, #tpu.memory_space<vmem>>, vector<1x64x8xf32>
    %36 = vector.shape_cast %35 : vector<1x64x8xf32> to vector<64x8xf32>
    %c0_27 = arith.constant 0 : index
    %c592 = arith.constant 592 : index
    %c0_28 = arith.constant 0 : index
    %37 = vector.load %arg3[%c0_27, %c592, %c0_28] : memref<1x664x128xf32, #tpu.memory_space<vmem>>, vector<1x64x8xf32>
    %38 = vector.shape_cast %37 : vector<1x64x8xf32> to vector<64x8xf32>
    %39 = vector.extract_strided_slice %21 {offsets = [0, 0], sizes = [8, 16], strides = [1, 1]} : vector<8x32xf32> to vector<8x16xf32>
    %cst_29 = arith.constant dense<0.000000e+00> : vector<64x16xf32>
    %40 = tpu.matmul %36, %39, %cst_29 {dimension_numbers = #tpu.dot_dimension_numbers<[1], [0], [0], [1], [0, 0, 1, 1], [], []>} : vector<64x8xf32>, vector<8x16xf32>, vector<64x16xf32> -> vector<64x16xf32>
    %41 = vector.extract_strided_slice %21 {offsets = [0, 16], sizes = [8, 16], strides = [1, 1]} : vector<8x32xf32> to vector<8x16xf32>
    %cst_30 = arith.constant dense<0.000000e+00> : vector<64x16xf32>
    %42 = tpu.matmul %38, %41, %cst_30 {dimension_numbers = #tpu.dot_dimension_numbers<[1], [0], [0], [1], [0, 0, 1, 1], [], []>} : vector<64x8xf32>, vector<8x16xf32>, vector<64x16xf32> -> vector<64x16xf32>
    %43 = arith.addf %40, %42 : vector<64x16xf32>
    %44 = arith.addf %43, %34 : vector<64x16xf32>
    %45 = arith.negf %44 : vector<64x16xf32>
    %46 = math.exp %45 : vector<64x16xf32>
    %cst_31 = arith.constant 1.000000e+00 : f32
    %47 = vector.broadcast %cst_31 : f32 to vector<64x16xf32>
    %48 = arith.addf %47, %46 : vector<64x16xf32>
    %49 = arith.divf %47, %48 : vector<64x16xf32>
    %c0_32 = arith.constant 0 : index
    %c512 = arith.constant 512 : index
    %c0_33 = arith.constant 0 : index
    %50 = vector.load %arg3[%c0_32, %c512, %c0_33] : memref<1x664x128xf32, #tpu.memory_space<vmem>>, vector<1x16x64xf32>
    %51 = vector.shape_cast %50 : vector<1x16x64xf32> to vector<16x64xf32>
    %cst_34 = arith.constant dense<0.000000e+00> : vector<64x64xf32>
    %52 = tpu.matmul %49, %51, %cst_34 {dimension_numbers = #tpu.dot_dimension_numbers<[1], [0], [0], [1], [0, 0, 1, 1], [], []>} : vector<64x16xf32>, vector<16x64xf32>, vector<64x64xf32> -> vector<64x64xf32>
    %cst_35 = arith.constant dense<0.000000e+00> : vector<64x64xf32>
    %53 = tpu.matmul %36, %14, %cst_35 {dimension_numbers = #tpu.dot_dimension_numbers<[1], [0], [0], [1], [0, 0, 1, 1], [], []>} : vector<64x8xf32>, vector<8x64xf32>, vector<64x64xf32> -> vector<64x64xf32>
    %54 = arith.mulf %53, %31 : vector<64x64xf32>
    %c0_36 = arith.constant 0 : index
    %c224 = arith.constant 224 : index
    %c0_37 = arith.constant 0 : index
    %55 = vector.load %arg3[%c0_36, %c224, %c0_37] : memref<1x664x128xf32, #tpu.memory_space<vmem>>, vector<1x64x64xf32>
    %56 = vector.shape_cast %55 : vector<1x64x64xf32> to vector<64x64xf32>
    %cst_38 = arith.constant dense<0.000000e+00> : vector<64x64xf32>
    %57 = tpu.matmul %54, %56, %cst_38 {dimension_numbers = #tpu.dot_dimension_numbers<[1], [0], [0], [1], [0, 0, 1, 1], [], []>} : vector<64x64xf32>, vector<64x64xf32>, vector<64x64xf32> -> vector<64x64xf32>
    %c0_39 = arith.constant 0 : index
    %c3 = arith.constant 3 : index
    %c0_40 = arith.constant 0 : index
    %58 = vector.load %arg4[%c0_39, %c3, %c0_40] : memref<1x16x128xf32, #tpu.memory_space<vmem>>, vector<1x1x64xf32>
    %59 = vector.shape_cast %58 : vector<1x1x64xf32> to vector<1x64xf32>
    %60 = vector.broadcast %59 : vector<1x64xf32> to vector<64x64xf32>
    %61 = arith.addf %57, %60 : vector<64x64xf32>
    %c0_41 = arith.constant 0 : index
    %c656 = arith.constant 656 : index
    %c0_42 = arith.constant 0 : index
    %62 = vector.load %arg3[%c0_41, %c656, %c0_42] : memref<1x664x128xf32, #tpu.memory_space<vmem>>, vector<1x8x64xf32>
    %63 = vector.shape_cast %62 : vector<1x8x64xf32> to vector<8x64xf32>
    %64 = arith.mulf %52, %61 : vector<64x64xf32>
    %cst_43 = arith.constant dense<0.000000e+00> : vector<8x64xf32>
    %65 = tpu.matmul %63, %64, %cst_43 {dimension_numbers = #tpu.dot_dimension_numbers<[1], [0], [0], [1], [0, 0, 1, 1], [], []>} : vector<8x64xf32>, vector<64x64xf32>, vector<8x64xf32> -> vector<8x64xf32>
    %cst_44 = arith.constant 0.000000e+00 : f32
    %66 = vector.broadcast %cst_44 : f32 to vector<8x64xf32>
    %67 = arith.maximumf %65, %66 : vector<8x64xf32>
    %c0_45 = arith.constant 0 : index
    %c288 = arith.constant 288 : index
    %c0_46 = arith.constant 0 : index
    %68 = vector.load %arg3[%c0_45, %c288, %c0_46] : memref<1x664x128xf32, #tpu.memory_space<vmem>>, vector<1x64x32xf32>
    %69 = vector.shape_cast %68 : vector<1x64x32xf32> to vector<64x32xf32>
    %cst_47 = arith.constant dense<0.000000e+00> : vector<8x32xf32>
    %70 = tpu.matmul %67, %69, %cst_47 {dimension_numbers = #tpu.dot_dimension_numbers<[1], [0], [0], [1], [0, 0, 1, 1], [], []>} : vector<8x64xf32>, vector<64x32xf32>, vector<8x32xf32> -> vector<8x32xf32>
    %c0_48 = arith.constant 0 : index
    %c4 = arith.constant 4 : index
    %c0_49 = arith.constant 0 : index
    %71 = vector.load %arg4[%c0_48, %c4, %c0_49] : memref<1x16x128xf32, #tpu.memory_space<vmem>>, vector<1x1x32xf32>
    %72 = vector.shape_cast %71 : vector<1x1x32xf32> to vector<1x32xf32>
    %73 = vector.broadcast %72 : vector<1x32xf32> to vector<8x32xf32>
    %74 = arith.addf %70, %73 : vector<8x32xf32>
    %75 = arith.addf %3, %74 : vector<8x32xf32>
    %c0_50 = arith.constant 0 : index
    %c5 = arith.constant 5 : index
    %c0_51 = arith.constant 0 : index
    %76 = vector.load %arg4[%c0_50, %c5, %c0_51] : memref<1x16x128xf32, #tpu.memory_space<vmem>>, vector<1x1x32xf32>
    %77 = vector.shape_cast %76 : vector<1x1x32xf32> to vector<1x32xf32>
    %c0_52 = arith.constant 0 : index
    %c6 = arith.constant 6 : index
    %c0_53 = arith.constant 0 : index
    %78 = vector.load %arg4[%c0_52, %c6, %c0_53] : memref<1x16x128xf32, #tpu.memory_space<vmem>>, vector<1x1x32xf32>
    %79 = vector.shape_cast %78 : vector<1x1x32xf32> to vector<1x32xf32>
    %cst_54 = arith.constant dense<0.000000e+00> : vector<8xf32>
    %80 = vector.multi_reduction <add>, %75, %cst_54 [1] : vector<8x32xf32> to vector<8xf32>
    %81 = vector.shape_cast %80 : vector<8xf32> to vector<8x1xf32>
    %cst_55 = arith.constant 3.200000e+01 : f32
    %82 = vector.broadcast %cst_55 : f32 to vector<8x1xf32>
    %83 = arith.divf %81, %82 : vector<8x1xf32>
    %84 = vector.broadcast %83 : vector<8x1xf32> to vector<8x32xf32>
    %85 = arith.subf %75, %84 : vector<8x32xf32>
    %86 = arith.mulf %85, %85 : vector<8x32xf32>
    %cst_56 = arith.constant dense<0.000000e+00> : vector<8xf32>
    %87 = vector.multi_reduction <add>, %86, %cst_56 [1] : vector<8x32xf32> to vector<8xf32>
    %88 = vector.shape_cast %87 : vector<8xf32> to vector<8x1xf32>
    %cst_57 = arith.constant 3.200000e+01 : f32
    %89 = vector.broadcast %cst_57 : f32 to vector<8x1xf32>
    %90 = arith.divf %88, %89 : vector<8x1xf32>
    %91 = vector.broadcast %83 : vector<8x1xf32> to vector<8x32xf32>
    %92 = arith.subf %75, %91 : vector<8x32xf32>
    %cst_58 = arith.constant 9.99999974E-6 : f32
    %93 = vector.broadcast %cst_58 : f32 to vector<8x1xf32>
    %94 = arith.addf %90, %93 : vector<8x1xf32>
    %95 = math.rsqrt %94 : vector<8x1xf32>
    %96 = vector.broadcast %95 : vector<8x1xf32> to vector<8x32xf32>
    %97 = arith.mulf %92, %96 : vector<8x32xf32>
    %98 = vector.broadcast %77 : vector<1x32xf32> to vector<8x32xf32>
    %99 = arith.mulf %97, %98 : vector<8x32xf32>
    %100 = vector.broadcast %79 : vector<1x32xf32> to vector<8x32xf32>
    %101 = arith.addf %99, %100 : vector<8x32xf32>
    %c0_59 = arith.constant 0 : index
    %c352 = arith.constant 352 : index
    %c0_60 = arith.constant 0 : index
    %102 = vector.load %arg3[%c0_59, %c352, %c0_60] : memref<1x664x128xf32, #tpu.memory_space<vmem>>, vector<1x32x128xf32>
    %103 = vector.shape_cast %102 : vector<1x32x128xf32> to vector<32x128xf32>
    %cst_61 = arith.constant dense<0.000000e+00> : vector<8x128xf32>
    %104 = tpu.matmul %101, %103, %cst_61 {dimension_numbers = #tpu.dot_dimension_numbers<[1], [0], [0], [1], [0, 0, 1, 1], [], []>} : vector<8x32xf32>, vector<32x128xf32>, vector<8x128xf32> -> vector<8x128xf32>
    %c0_62 = arith.constant 0 : index
    %c7 = arith.constant 7 : index
    %c0_63 = arith.constant 0 : index
    %105 = vector.load %arg4[%c0_62, %c7, %c0_63] : memref<1x16x128xf32, #tpu.memory_space<vmem>>, vector<1x1x128xf32>
    %106 = vector.shape_cast %105 : vector<1x1x128xf32> to vector<1x128xf32>
    %107 = vector.broadcast %106 : vector<1x128xf32> to vector<8x128xf32>
    %108 = arith.addf %104, %107 : vector<8x128xf32>
    %cst_64 = arith.constant 0.000000e+00 : f32
    %109 = vector.broadcast %cst_64 : f32 to vector<8x128xf32>
    %110 = arith.maximumf %108, %109 : vector<8x128xf32>
    %c0_65 = arith.constant 0 : index
    %c384 = arith.constant 384 : index
    %c0_66 = arith.constant 0 : index
    %111 = vector.load %arg3[%c0_65, %c384, %c0_66] : memref<1x664x128xf32, #tpu.memory_space<vmem>>, vector<1x128x32xf32>
    %112 = vector.shape_cast %111 : vector<1x128x32xf32> to vector<128x32xf32>
    %cst_67 = arith.constant dense<0.000000e+00> : vector<8x32xf32>
    %113 = tpu.matmul %110, %112, %cst_67 {dimension_numbers = #tpu.dot_dimension_numbers<[1], [0], [0], [1], [0, 0, 1, 1], [], []>} : vector<8x128xf32>, vector<128x32xf32>, vector<8x32xf32> -> vector<8x32xf32>
    %c0_68 = arith.constant 0 : index
    %c8 = arith.constant 8 : index
    %c0_69 = arith.constant 0 : index
    %114 = vector.load %arg4[%c0_68, %c8, %c0_69] : memref<1x16x128xf32, #tpu.memory_space<vmem>>, vector<1x1x32xf32>
    %115 = vector.shape_cast %114 : vector<1x1x32xf32> to vector<1x32xf32>
    %116 = vector.broadcast %115 : vector<1x32xf32> to vector<8x32xf32>
    %117 = arith.addf %113, %116 : vector<8x32xf32>
    %118 = arith.addf %101, %117 : vector<8x32xf32>
    %c0_70 = arith.constant 0 : index
    %c9 = arith.constant 9 : index
    %c0_71 = arith.constant 0 : index
    %119 = vector.load %arg4[%c0_70, %c9, %c0_71] : memref<1x16x128xf32, #tpu.memory_space<vmem>>, vector<1x1x32xf32>
    %120 = vector.shape_cast %119 : vector<1x1x32xf32> to vector<1x32xf32>
    %c0_72 = arith.constant 0 : index
    %c10 = arith.constant 10 : index
    %c0_73 = arith.constant 0 : index
    %121 = vector.load %arg4[%c0_72, %c10, %c0_73] : memref<1x16x128xf32, #tpu.memory_space<vmem>>, vector<1x1x32xf32>
    %122 = vector.shape_cast %121 : vector<1x1x32xf32> to vector<1x32xf32>
    %cst_74 = arith.constant dense<0.000000e+00> : vector<8xf32>
    %123 = vector.multi_reduction <add>, %118, %cst_74 [1] : vector<8x32xf32> to vector<8xf32>
    %124 = vector.shape_cast %123 : vector<8xf32> to vector<8x1xf32>
    %cst_75 = arith.constant 3.200000e+01 : f32
    %125 = vector.broadcast %cst_75 : f32 to vector<8x1xf32>
    %126 = arith.divf %124, %125 : vector<8x1xf32>
    %127 = vector.broadcast %126 : vector<8x1xf32> to vector<8x32xf32>
    %128 = arith.subf %118, %127 : vector<8x32xf32>
    %129 = arith.mulf %128, %128 : vector<8x32xf32>
    %cst_76 = arith.constant dense<0.000000e+00> : vector<8xf32>
    %130 = vector.multi_reduction <add>, %129, %cst_76 [1] : vector<8x32xf32> to vector<8xf32>
    %131 = vector.shape_cast %130 : vector<8xf32> to vector<8x1xf32>
    %cst_77 = arith.constant 3.200000e+01 : f32
    %132 = vector.broadcast %cst_77 : f32 to vector<8x1xf32>
    %133 = arith.divf %131, %132 : vector<8x1xf32>
    %134 = vector.broadcast %126 : vector<8x1xf32> to vector<8x32xf32>
    %135 = arith.subf %118, %134 : vector<8x32xf32>
    %cst_78 = arith.constant 9.99999974E-6 : f32
    %136 = vector.broadcast %cst_78 : f32 to vector<8x1xf32>
    %137 = arith.addf %133, %136 : vector<8x1xf32>
    %138 = math.rsqrt %137 : vector<8x1xf32>
    %139 = vector.broadcast %138 : vector<8x1xf32> to vector<8x32xf32>
    %140 = arith.mulf %135, %139 : vector<8x32xf32>
    %141 = vector.broadcast %120 : vector<1x32xf32> to vector<8x32xf32>
    %142 = arith.mulf %140, %141 : vector<8x32xf32>
    %143 = vector.broadcast %122 : vector<1x32xf32> to vector<8x32xf32>
    %144 = arith.addf %142, %143 : vector<8x32xf32>
    %c0_79 = arith.constant 0 : index
    %c0_80 = arith.constant 0 : index
    %145 = vector.load %arg5[%c0_79, %c0_80] : memref<8x32xf32, #tpu.memory_space<vmem>>, vector<8x32xf32>
    tpu.vector_store %arg5[%c0_79, %c0_80], %144 {strides = array<i32>} : memref<8x32xf32, #tpu.memory_space<vmem>>, vector<8x32xf32>,
    return
  }
  func.func @transform_0(%arg0: i32) -> (i32, i32) {
    %c0_i32 = arith.constant 0 : i32
    %c0_i32_0 = arith.constant 0 : i32
    %c0_i32_1 = arith.constant 0 : i32
    return %c0_i32, %c0_i32_0 : i32, i32
  }
  func.func @transform_1(%arg0: i32) -> (i32, i32) {
    %c0_i32 = arith.constant 0 : i32
    %c0_i32_0 = arith.constant 0 : i32
    %c0_i32_1 = arith.constant 0 : i32
    return %c0_i32, %c0_i32_0 : i32, i32
  }
  func.func @transform_2(%arg0: i32) -> (i32, i32, i32) {
    %c0_i32 = arith.constant 0 : i32
    %c0_i32_0 = arith.constant 0 : i32
    %c0_i32_1 = arith.constant 0 : i32
    return %arg0, %c0_i32, %c0_i32_0 : i32, i32, i32
  }
  func.func @transform_3(%arg0: i32) -> (i32, i32, i32) {
    %c0_i32 = arith.constant 0 : i32
    %c0_i32_0 = arith.constant 0 : i32
    %c0_i32_1 = arith.constant 0 : i32
    return %arg0, %c0_i32, %c0_i32_0 : i32, i32, i32
  }
  func.func @transform_4(%arg0: i32) -> (i32, i32) {
    %c0_i32 = arith.constant 0 : i32
    %c0_i32_0 = arith.constant 0 : i32
    %c0_i32_1 = arith.constant 0 : i32
    return %c0_i32, %c0_i32_0 : i32, i32
  }
}

</mosaic_0001>

<bundles_post_ra>
// kernel: forward.1
= control target key start
LH: loop header
LB: loop body
LE: loop exit
PB: predicated region body
PF: predicated region fallthrough
CT: control target
= control target key end

     0   :  { %9 = vsyncpa [#allocation3], 0  ;;  %s3504_s0 = inlined_call_operand.hbm [shape: f32[8,32], index: 0, kind: input, shape index: {}]   ;;  %s3505_s1 = inlined_call_operand.hbm [shape: f32[64,64], index: 1, kind: input, shape index: {}]   ;;  %s3506_s2 = inlined_call_operand.hbm [shape: f32[2,664,128], index: 2, kind: input, shape index: {}]   ;;  %s3507_s3 = inlined_call_operand.hbm [shape: f32[2,16,128], index: 3, kind: input, shape index: {}]   ;;  %s3508_s4 = inlined_call_operand.hbm [shape: f32[8,32], index: 4, kind: output, shape index: {}]  }
   0x1   :  { %10 = vsyncpa [#allocation6], 0 }
   0x2   :  { %11 = vsyncpa [#allocation4], 0  ;;  %s2939_s15 = smov 0   ;;  %s2941_s16 = smov 0  }
   0x3   :  { %s2943_s17 = smov 0   ;;  %s2945_s18 = smov 0  }
   0x4 LB: > { %s2958_s19 = sadd.s32 4294967295, %s2900_s18   ;;  %s2961_s20 = sadd.s32 1, %s2900_s18   ;;  %s2900_s18 = sphi %s2945_s18, %s3532_s18   ;;  %s2896_s17 = sphi %s2943_s17, %s3531_s17   ;;  %s2892_s16 = sphi %s2941_s16, %s3530_s16   ;;  %s2888_s15 = sphi %s2939_s15, %s3529_s15  }
   0x5   : > { %s63_s21 = ssub.s32 %s2900_s18, %s2961_s20  ;;  %s66_s22 = sadd.s32 1, %s2896_s17 }
   0x6   : > { %p64_p0 = scmp.eq.s32.totalorder %s63_s21, 0  ;;  %p73_p1 = scmp.ne.s32.totalorder %s2896_s17, %s2892_s16 }
   0x7   : > { %p74_p2 = scmp.eq.s32.totalorder %s2900_s18, 0  ;;  %p79_p3 = scmp.ne.s32.totalorder %s2892_s16, %s2888_s15 }
   0x8   : > { %s2971_s23 = scalar_select %p64_p0, %s2896_s17, %s66_s22  }
   0x9   : > { %p2973_p4 = por %p74_p2, %p73_p1  ;;  %p3509_p5 = scmp.eq.s32.totalorder %s2958_s19, 0 }
   0xa   : > { %p1959_p6 = scmp.ge.s32.totalorder %s2900_s18, 1  ;;  %p137_p7 = scmp.lt.s32.totalorder %s2900_s18, 3 }
   0xb   : > { %p2982_p8 = por %p3509_p5, %p79_p3  ;;  %s2902_s27 = smov [#allocation2]  }
   0xc   : > { %p2987_p10 = pnand %p1959_p6, %p137_p7  ;;  %s150_s28 = sshll.u32 %s2902_s27, 4  ;;  %s151_s28 = int_to_ptr.vmem [resolvable:$true] %s150_s28 }
   0xd   : > { %s3515_s25 = scalar_select %p2982_p8, 1, 0 }
   0xe   : > { %s3516_s26 = scalar_select %p2987_p10, 1, 0 }
   0xf   : > { %p2613_p11 = pneg %p2987_p10  ;;  %p2629_p12 = scmp.lt.s32.totalorder %s2900_s18, 2 }
  0x10   : > { %s174_s5 = sand.u32 1, %s2900_s18   ;;  %s2712_s8 = scalar_lea.hbm %s3504_s0, 128 }
  0x11   : > { %p2996_p13 = pnand %p2613_p11, %p3509_p5  ;;  %p3002_p0 = pnand %p2629_p12, %p2973_p4 }
  0x12   : > { %p2713_p1 = scmp.ne.s32.totalorder %s3504_s0, %s2712_s8  ;;  %p2719_p4 = scmp.lt.u32.totalorder %s2712_s8, %s3504_s0 }
  0x13   : > { %s3518_s30 = scalar_select %p3002_p0, 1, 0 }
  0x14   : > { %p3513_p2 = pneg %p2996_p13 }
  0x16   : > { %p2715_p3 = pnand %p3513_p2, %p2713_p1 }
  0x18   : > { %p2716_p6 = pneg %p2715_p3 }
  0x1a   : > { %p2721_p7 = pnand %p2719_p4, %p2716_p6 }
  0x1c   : > { %2724 = shalt.err (!%p2721_p7)
}
  0x1d   : > { %s2725_s13 = scalar_lea.vmem %s151_s28, 128  ;;  %p2733_p5 = scmp.lt.s32.totalorder %s151_s28, %s151_s28 }
  0x1e   : > { %p2726_p11 = scmp.ne.s32.totalorder %s151_s28, %s2725_s13  ;;  %p2734_p8 = scmp.lt.s32.totalorder %s2725_s13, %s2725_s13 }
  0x20   : > { %p2728_p12 = pnand %p2726_p11, %p3513_p2  ;;  %p2735_p10 = por %p2734_p8, %p2733_p5 }
  0x22   : > { %p2729_p9 = pneg %p2728_p12 }
  0x24   : > { %p2736_p0 = pnand %p2735_p10, %p2729_p9 }
  0x26   : > { %2739 = shalt.err (!%p2736_p0)
}
  0x27   : > { %2616 = dma.hbm_to_vmem [thread:$0]  (!%p2996_p13), %s3504_s0, 128, %s151_s28, [#allocation3]  }
  0x28   : > { %s176_s21 = sand.u32 1, %s2896_s17   ;;  %s2595_s24 = smul.u32 10624, %s2900_s18 }
  0x29   : > { %s2594_s22 = smul.u32 664, %s176_s21  ;;  %s2903_s27 = smov [#allocation5]  }
  0x2a   : > { %s160_s6 = sshll.u32 %s2903_s27, 4  ;;  %s3036_s9 = scalar_lea.hbm %s3506_s2, %s2595_s24  ;;  %s3031_s6 = int_to_ptr.vmem [resolvable:$true] %s160_s6 }
  0x2b   : > { %s178_s10 = scalar_lea.vmem [#allocation7], %s2594_s22  ;;  %s3040_s28 = sshll.u32 %s176_s21, 4 }
  0x2c   : > { %s185_s11 = sshll.u32 %s178_s10, 4  ;;  %s3044_s12 = scalar_lea.sflag [#allocation3], %s174_s5  ;;  %s3038_s11 = int_to_ptr.vmem [resolvable:$true] %s185_s11 }
  0x2d   : > { %s2740_s13 = scalar_lea.hbm %s3036_s9, 10624  ;;  %p3519_p8 = scmp.ne.s32.totalorder %s3518_s30, 0 }
  0x2e   : > { %p2741_p5 = scmp.ne.s32.totalorder %s3036_s9, %s2740_s13  ;;  %s2745_s22 = scalar_lea.hbm %s3506_s2, 21248 }
  0x2f   : > { %p2742_p9 = pneg %p3519_p8  ;;  %p2746_p1 = scmp.lt.u32.totalorder %s3036_s9, %s3506_s2 }
  0x30   : > { %p2747_p3 = scmp.lt.u32.totalorder %s2745_s22, %s2740_s13  ;;  %p2749_p4 = scmp.lt.u32.totalorder %s2740_s13, %s3036_s9 }
  0x31   : > { %p2743_p10 = pnand %p2742_p9, %p2741_p5 }
  0x32   : > { %p2748_p6 = por %p2747_p3, %p2746_p1 }
  0x33   : > { %p2744_p0 = pneg %p2743_p10 }
  0x34   : > { %p2750_p7 = por %p2749_p4, %p2748_p6 }
  0x36   : > { %p2751_p11 = pnand %p2750_p7, %p2744_p0 }
  0x38   : > { %2754 = shalt.err (!%p2751_p11)
}
  0x39   : > { %s2755_s5 = scalar_lea.vmem %s3038_s11, 10624  ;;  %s2904_s21 = smov [#allocation7]  }
  0x3a   : > { %p2756_p12 = scmp.ne.s32.totalorder %s3038_s11, %s2755_s5  ;;  %s2760_s7 = sshll.u32 %s2904_s21, 4  ;;  %s2761_s7 = int_to_ptr.vmem [resolvable:$false] %s2760_s7 }
  0x3b   : > { %s2762_s8 = scalar_lea.vmem %s2761_s7, 21248  ;;  %p2763_p2 = scmp.lt.s32.totalorder %s3038_s11, %s2761_s7 }
  0x3c   : > { %p2758_p5 = pnand %p2756_p12, %p2742_p9  ;;  %p2764_p1 = scmp.lt.s32.totalorder %s2762_s8, %s2755_s5 }
  0x3e   : > { %p2759_p10 = pneg %p2758_p5  ;;  %p2765_p3 = por %p2764_p1, %p2763_p2 }
  0x40   : > { %p2766_p6 = pnand %p2765_p3, %p2759_p10 }
  0x42   : > { %2769 = shalt.err (!%p2766_p6)
}
  0x43   : > { %s2905_s10 = smov 128   ;;  %s2906_s13 = smov 8  }
  0x44   : > { %2623 = dma.hbm_to_vmem [thread:$0]  (!%p3519_p8), %s3036_s9, 10624, %s3038_s11, %s3044_s12, %s2905_s10, %s2905_s10, %s2906_s13  }
  0x45   : > { %s2770_s22 = scalar_lea.hbm %s3505_s1, 1024  ;;  %p3520_p0 = pneg %p2996_p13 }
  0x46   : > { %p2771_p2 = scmp.ne.s32.totalorder %s3505_s1, %s2770_s22  ;;  %p2777_p11 = scmp.lt.u32.totalorder %s2770_s22, %s3505_s1 }
  0x48   : > { %p2773_p4 = pnand %p2771_p2, %p3520_p0 }
  0x4a   : > { %p2774_p7 = pneg %p2773_p4 }
  0x4c   : > { %p2779_p12 = pnand %p2777_p11, %p2774_p7 }
  0x4e   : > { %2782 = shalt.err (!%p2779_p12)
}
  0x4f   : > { %s2783_s9 = scalar_lea.vmem %s3031_s6, 1024  ;;  %p3521_p10 = pmov %p3520_p0 }
  0x50   : > { %p2784_p5 = scmp.ne.s32.totalorder %s3031_s6, %s2783_s9  ;;  %p2791_p6 = scmp.lt.s32.totalorder %s3031_s6, %s3031_s6 }
  0x51   : > { %p2792_p2 = scmp.lt.s32.totalorder %s2783_s9, %s2783_s9 }
  0x52   : > { %p2786_p1 = pnand %p2784_p5, %p3521_p10 }
  0x53   : > { %p2793_p0 = por %p2792_p2, %p2791_p6 }
  0x54   : > { %p2787_p3 = pneg %p2786_p1 }
  0x56   : > { %p2794_p4 = pnand %p2793_p0, %p2787_p3 }
  0x58   : > { %2797 = shalt.err (!%p2794_p4)
}
  0x59   : > { %2619 = dma.hbm_to_vmem [thread:$0]  (!%p2996_p13), %s3505_s1, 1024, %s3031_s6, [#allocation6], %s2905_s10, %s2905_s10, %s2906_s13  }
  0x5a   : > { %s2056_s8 = sshll.u32 %s2900_s18, 8  ;;  %s199_s29 = scalar_lea.vmem [#allocation8], %s3040_s28 }
  0x5b   : > { %s3107_s22 = scalar_lea.hbm %s3507_s3, %s2056_s8  ;;  %s206_s24 = sshll.u32 %s199_s29, 4  ;;  %s3110_s24 = int_to_ptr.vmem [resolvable:$true] %s206_s24 }
  0x5c   : > { %s2798_s27 = scalar_lea.hbm %s3107_s22, 256  ;;  %s2803_s5 = scalar_lea.hbm %s3507_s3, 512 }
  0x5d   : > { %p2799_p7 = scmp.ne.s32.totalorder %s3107_s22, %s2798_s27  ;;  %p2804_p12 = scmp.lt.u32.totalorder %s3107_s22, %s3507_s3 }
  0x5e   : > { %p2805_p5 = scmp.lt.u32.totalorder %s2803_s5, %s2798_s27  ;;  %p2807_p1 = scmp.lt.u32.totalorder %s2798_s27, %s3107_s22 }
  0x5f   : > { %p2801_p11 = pnand %p2799_p7, %p2742_p9 }
  0x60   : > { %p2806_p10 = por %p2805_p5, %p2804_p12 }
  0x61   : > { %p2802_p13 = pneg %p2801_p11 }
  0x62   : > { %p2808_p3 = por %p2807_p1, %p2806_p10 }
  0x64   : > { %p2809_p6 = pnand %p2808_p3, %p2802_p13 }
  0x66   : > { %2812 = shalt.err (!%p2809_p6)
}
  0x67   : > { %s2813_s28 = scalar_lea.vmem %s3110_s24, 256  ;;  %s2907_s11 = smov [#allocation8]  }
  0x68   : > { %p2814_p2 = scmp.ne.s32.totalorder %s3110_s24, %s2813_s28  ;;  %s2818_s7 = sshll.u32 %s2907_s11, 4  ;;  %s2819_s7 = int_to_ptr.vmem [resolvable:$false] %s2818_s7 }
  0x69   : > { %s2820_s8 = scalar_lea.vmem %s2819_s7, 512  ;;  %p2821_p7 = scmp.lt.s32.totalorder %s3110_s24, %s2819_s7 }
  0x6a   : > { %p2816_p0 = pnand %p2814_p2, %p2742_p9  ;;  %p2822_p11 = scmp.lt.s32.totalorder %s2820_s8, %s2813_s28 }
  0x6c   : > { %p2817_p4 = pneg %p2816_p0  ;;  %p2823_p12 = por %p2822_p11, %p2821_p7 }
  0x6e   : > { %p2824_p5 = pnand %p2823_p12, %p2817_p4 }
  0x70   : > { %2827 = shalt.err (!%p2824_p5)
}
  0x71   : > { %2626 = dma.hbm_to_vmem [thread:$0]  (!%p3519_p8), %s3107_s22, 256, %s3110_s24, %s3044_s12, %s2905_s10, %s2905_s10, %s2906_s13  }
  0x72   : > { %p3522_p9 = scmp.ne.s32.totalorder %s3516_s26, 0 }
  0x73   : > { %p3523_p13 = scmp.eq.s32.totalorder (!%p3522_p9), %s2958_s19, 0 }
  0x74   : > { %218 = sbr.rel (%p3522_p9) target bundleno = 2922 (0xb6a), region = 36 }
  0x7b   : > { %2871 = dma.done.wait (%p3523_p13), [#allocation3], 128   ;;  %p3524_p10 = pmov %p3523_p13 }
  0x7d   : > { %2873 = vsyncadd (%p3524_p10), [#allocation3], 4294967168  ;;  %p3525_p1 = pmov %p3524_p10 }
  0x7f   : > { %2875 = dma.done.wait (%p3525_p1), [#allocation6], 1024   ;;  %p3526_p3 = pmov %p3525_p1 }
  0x80   : > { %s228_s30 = sand.u32 1, %s2958_s19   ;;  %s230_s12 = sand.u32 1, %s2892_s16  }
  0x81   : > { %2877 = vsyncadd (%p3526_p3), [#allocation6], 4294966272  ;;  %s2596_s10 = smul.u32 664, %s230_s12  ;;  %s229_s26 = scalar_lea.sflag [#allocation3], %s228_s30 }
  0x82   : > { %p3527_p8 = scmp.ne.s32.totalorder %s3515_s25, 0 }
  0x83   : > { %s3151_s13 = scalar_lea.vmem [#allocation7], %s2596_s10 }
  0x84   : > { %2879 = dma.done.wait (%p3527_p8), %s229_s26, 10880  }
  0x85   : > { %2881 = vsyncadd (%p3527_p8), %s229_s26, 4294956416  ;;  %s1970_s14 = sshll.u32 %s230_s12, 4  ;;  %p3528_p6 = scmp.ne.s32.totalorder %s2958_s19, 0 }
  0x86   : > { %s3157_s15 = scalar_lea.vmem [#allocation8], %s1970_s14  ;;  %v270_v0 = vld [vmem:[#allocation2] sm:$0xff] (!%p3528_p6)  ;;  %vm271_vm0 = vcmask (!%p3528_p6), 261120  }
  0x87   : > { %269 = sbr.rel (%p3528_p6) target bundleno = 142 (0x8e), region = 56  ;;  %272 = vst.msk [vmem:[#allocation9] sm:$0xff] (!%p3528_p6), %vm271_vm0, %v270_v0 }
  0x8e PF: > { %v274_v1 = vld [vmem:[%s3151_s13] sm:$0xff]  ;;  %v275_v2 = vld [vmem:[%s3151_s13 + $0x8] sm:$0xff]  ;;  %v276_v3 = vld [vmem:[%s3151_s13 + $0x10] sm:$0xff]  ;;  %v2908_v4 = vmov 0.0|0.0   ;;  %vm2909_vm1 = vmmov 0   ;;  %v2910_v7 = vmov 0.0  }
  0x8f   : > { %2452 = vmatprep.subr.bf16.mxu0 %v2908_v4  ;;  %v2453_v5 = vpack.c.bf16 %v275_v2, %v274_v1  ;;  %v277_v6 = vld [vmem:[%s3151_s13 + $0x18] sm:$0xff]  ;;  %2204 = vmatprep.mubr.msk.f32.mxu0 %vm2909_vm1, %v2910_v7  ;;  %v358_v8 = vld [vmem:[%s3151_s13 + $0x60] sm:$0xff]  ;;  %v359_v9 = vld [vmem:[%s3151_s13 + $0x68] sm:$0xff]  ;;  %vm283_vm2 = vcmask 261120   ;;  %vm371_vm3 = vcmask 523264   ;;  %vm760_vm4 = vcmask 64512  }
  0x90   : > { %2458 = vmatprep.subr.bf16.mxu1 %v2908_v4  ;;  %v360_v10 = vld [vmem:[%s3151_s13 + $0x70] sm:$0xff]  ;;  %v361_v11 = vld [vmem:[%s3151_s13 + $0x78] sm:$0xff]  ;;  %2223 = vmatprep.mubr.msk.f32.mxu1 %vm2909_vm1, %v2910_v7  ;;  %v2456_v12 = vpack.c.bf16 %v277_v6, %v276_v3  ;;  %v2459_v13 = vpack.c.bf16 %v359_v9, %v358_v8  ;;  %v362_v15 = vld [vmem:[%s3151_s13 + $0x80] sm:$0xff]  ;;  %s2911_s25 = smov 112   ;;  %s2912_s22 = smov 64   ;;  %vm1077_vm5 = vcmask 130048  }
  0x91   : > { %2454 = vmatpush3.bf16.msra.mxu0 %v2453_v5  ;;  %v2462_v14 = vpack.c.bf16 %v361_v11, %v360_v10  ;;  %v363_v16 = vld [vmem:[%s3151_s13 + $0x88] sm:$0xff]  ;;  %v3179_v17 = vld [vmem:[#allocation9] sm:$0xff]  ;;  %v453_v22 = vld [vmem:[%s3151_s13 + $0x20] sm:$0xff]  ;;  %s2913_s29 = smov [#allocation9]   ;;  %p2632_p2 = scmp.eq.s32.totalorder %s2958_s19, 1 }
  0x92   : > { %2455 = vmatprep.subr.bf16.mxu0 %v2908_v4  ;;  %2460 = vmatpush3.bf16.msra.mxu1 %v2459_v13  ;;  %v2465_v18 = vpack.c.bf16 %v363_v16, %v362_v15  ;;  %v364_v19 = vld [vmem:[%s3151_s13 + $0x90] sm:$0xff]  ;;  %v365_v20 = vld [vmem:[%s3151_s13 + $0x98] sm:$0xff]  ;;  %v454_v23 = vld [vmem:[%s3151_s13 + $0x28] sm:$0xff]  ;;  %s1869_s24 = sshll.u32 %s2913_s29, 4  ;;  %s1870_s24 = int_to_ptr.vmem [resolvable:$true] %s1869_s24 }
  0x93   : > { %2461 = vmatprep.subr.bf16.mxu1 %v2908_v4  ;;  %v2468_v21 = vpack.c.bf16 %v365_v20, %v364_v19  ;;  %v2470_v24 = vpack.c.bf16 %v454_v23, %v453_v22  ;;  %v1972_v25 = vld [vmem:[%s3157_s15] ss:$0 sm:$0xff]  ;;  %v456_v28 = vld [vmem:[%s3151_s13 + $0x38] sm:$0xff]  ;;  %v457_v34 = vld [vmem:[%s3151_s13 + $0x40] sm:$0xff]  ;;  %s2828_s27 = scalar_lea.vmem %s1870_s24, 128  ;;  %p2835_p11 = scmp.lt.s32.totalorder %s1870_s24, %s1870_s24 }
  0x94   : > { %v455_v27 = vld [vmem:[%s3151_s13 + $0x30] sm:$0xff]  ;;  %v445_v33 = vld [vmem:[#allocation5] sm:$0xff]  ;;  %v460_v38 = vld [vmem:[%s3151_s13 + $0x58] sm:$0xff]  ;;  %p2829_p0 = scmp.ne.s32.totalorder %s1870_s24, %s2828_s27  ;;  %p2836_p12 = scmp.lt.s32.totalorder %s2828_s27, %s2828_s27 }
  0x95   : > { %2457 = vmatpush3.bf16.msra.mxu0 %v2456_v12  ;;  %v2474_v32 = vpack.c.bf16 %v456_v28, %v455_v27  ;;  %v458_v35 = vld [vmem:[%s3151_s13 + $0x48] sm:$0xff]  ;;  %v459_v37 = vld [vmem:[%s3151_s13 + $0x50] sm:$0xff]  ;;  %v448_v42 = vld [vmem:[#allocation5 + $0x18] sm:$0xff] }
  0x96   : > { %2463 = vmatpush3.bf16.msra.mxu1 %v2462_v14  ;;  %v2478_v36 = vpack.c.bf16 %v458_v35, %v457_v34  ;;  %v2482_v39 = vpack.c.bf16 %v460_v38, %v459_v37  ;;  %v446_v40 = vld [vmem:[#allocation5 + $0x8] sm:$0xff]  ;;  %v447_v41 = vld [vmem:[#allocation5 + $0x10] sm:$0xff]  ;;  %v449_v43 = vld [vmem:[#allocation5 + $0x20] sm:$0xff]  ;;  %p2830_p4 = pnand %p2829_p0, %p2632_p2  ;;  %p2837_p5 = por %p2836_p12, %p2835_p11 }
  0x97   : > { %2464 = vmatprep.subr.bf16.mxu1 %v2908_v4  ;;  %v450_v44 = vld [vmem:[#allocation5 + $0x28] sm:$0xff]  ;;  %v451_v45 = vld [vmem:[#allocation5 + $0x30] sm:$0xff]  ;;  %v452_v46 = vld [vmem:[#allocation5 + $0x38] sm:$0xff] }
  0x98   : > { %2205 = vmatmul.mubr.msk.f32.vlgmr.msra.gmra.mrb[0].mxu0 %vm283_vm2, %v3179_v17  ;;  %v603_v47 = vld [vmem:[%s3151_s13 + $0xa0] sm:$0xff]  ;;  %v604_v48 = vld [vmem:[%s3151_s13 + $0xa8] sm:$0xff]  ;;  %v605_v49 = vld [vmem:[%s3151_s13 + $0xb0] sm:$0xff]  ;;  %p2831_p7 = pneg %p2830_p4 }
  0x99   : > { %v2486_v50 = vpack.c.bf16 %v604_v48, %v603_v47  ;;  %v606_v51 = vld [vmem:[%s3151_s13 + $0xb8] sm:$0xff]  ;;  %v607_v53 = vld [vmem:[%s3151_s13 + $0xc0] sm:$0xff]  ;;  %v608_v54 = vld [vmem:[%s3151_s13 + $0xc8] sm:$0xff] }
  0x9a   : > { %2466 = vmatpush3.bf16.msra.mxu1 %v2465_v18  ;;  %v2490_v52 = vpack.c.bf16 %v606_v51, %v605_v49  ;;  %v2494_v55 = vpack.c.bf16 %v608_v54, %v607_v53  ;;  %v609_v56 = vld [vmem:[%s3151_s13 + $0xd0] sm:$0xff]  ;;  %v610_v57 = vld [vmem:[%s3151_s13 + $0xd8] sm:$0xff]  ;;  %v750_v28 = vld [vmem:[%s3151_s13 + $0x260] sm:$0xff]  ;;  %p2838_p9 = pnand %p2837_p5, %p2831_p7 }
  0x9b   : > { %2467 = vmatprep.subr.bf16.mxu1 %v2908_v4  ;;  %v2498_v58 = vpack.c.bf16 %v610_v57, %v609_v56  ;;  %v748_v59 = vld [vmem:[%s3151_s13 + $0x250] sm:$0xff]  ;;  %v753_v37 = vld [vmem:[%s3151_s13 + $0x278] sm:$0xff]  ;;  %v754_v38 = vld [vmem:[%s3151_s13 + $0x280] sm:$0xff] }
  0x9c   : > { %2284 = vmatprep.mubr.msk.f32.mxu0 %vm760_vm4, %v748_v59  ;;  %v1974_v60 = vld [vmem:[%s3157_s15 + $0x2] ss:$0 sm:$0xff]  ;;  %v1976_v0 = vld [vmem:[%s3157_s15 + $0x1] ss:$0 sm:$0xff] }
  0x9d   : > { %v752_v35 = vld [vmem:[%s3151_s13 + $0x270] sm:$0xff]  ;;  %v3324_v47 = vld [vmem:[%s3151_s13 + $0x248] sm:$0xff] }
  0x9e   : > { %2469 = vmatpush3.bf16.msra.mxu1 %v2468_v21 }
  0x9f   : > { %2471 = vmatprep.subr.bf16.mxu1 %v2470_v24 }
 0x16b   : > { %v353_v26 = vpop.f32.mrb[0].mxu0 }
 0x16c   : > { %v3192_v29 = vadd.f32 %v1972_v25, %v353_v26  ;;  %v2206_v30 = vpop.f32.mrb[1].mxu0 }
 0x16d   : > { %v1076_v30 = vld [vmem:[%s3151_s13 + $0x208] sm:$0xff] }
 0x16e   : > { %v357_v31 = vmax.f32 %v3192_v29, 0.0  ;;  %v1075_v29 = vld [vmem:[%s3151_s13 + $0x200] sm:$0xff] }
 0x16f   : > { %v2502_v34 = vpack.c.bf16 %v1076_v30, %v1075_v29 }
 0x170   : > { %2224 = vmatmul.mubr.msk.f32.vlgmr.msra.gmra.mrb[0].mxu1 %vm371_vm3, %v357_v31 }
 0x171   : > { %2473 = vmatpush3.bf16.msra.mxu1 %v2470_v24  ;;  %2242 = vmatprep.mubr.msk.f32.mxu1 %vm371_vm3, %v445_v33  ;;  %v751_v33 = vld [vmem:[%s3151_s13 + $0x268] sm:$0xff] }
 0x172   : > { %2475 = vmatprep.subr.bf16.mxu1 %v2474_v32 }
 0x175   : > { %2477 = vmatpush3.bf16.msra.mxu1 %v2474_v32  ;;  %v749_v32 = vld [vmem:[%s3151_s13 + $0x258] sm:$0xff] }
 0x176   : > { %2479 = vmatprep.subr.bf16.mxu1 %v2478_v36 }
 0x179   : > { %2481 = vmatpush3.bf16.msra.mxu1 %v2478_v36 }
 0x17a   : > { %2483 = vmatprep.subr.bf16.mxu1 %v2482_v39 }
 0x17d   : > { %2485 = vmatpush3.bf16.msra.mxu1 %v2482_v39  ;;  %v755_v39 = vld [vmem:[%s3151_s13 + $0x288] sm:$0xff] }
 0x17e   : > { %2487 = vmatprep.subr.bf16.mxu1 %v2486_v50 }
 0x180   : > { %2243 = vmatmul.mubr.msk.f32.vlgmr.msra.gmra.mrb[2].mxu1 %vm371_vm3, %v446_v40  ;;  %v3288_v40 = vld [vmem:[%s3151_s13 + $0x210] sm:$0xff] }
 0x181   : > { %2245 = vmatprep.mubr.msk.f32.mxu1 %vm371_vm3, %v447_v41  ;;  %2489 = vmatpush3.bf16.msra.mxu1 %v2486_v50  ;;  %v3294_v41 = vld [vmem:[%s3151_s13 + $0x218] sm:$0xff] }
 0x182   : > { %2491 = vmatprep.subr.bf16.mxu1 %v2490_v52 }
 0x184   : > { %2246 = vmatmul.mubr.msk.f32.gmra.mrb[4].mxu1 %vm371_vm3, %v448_v42  ;;  %v3297_v42 = vld [vmem:[%s3151_s13 + $0x220] sm:$0xff] }
 0x185   : > { %2248 = vmatprep.mubr.msk.f32.mxu1 %vm371_vm3, %v449_v43  ;;  %2493 = vmatpush3.bf16.msra.mxu1 %v2490_v52  ;;  %v3304_v43 = vld [vmem:[%s3151_s13 + $0x228] sm:$0xff] }
 0x186   : > { %2495 = vmatprep.subr.bf16.mxu1 %v2494_v55 }
 0x188   : > { %2249 = vmatmul.mubr.msk.f32.gmra.mrb[6].mxu1 %vm371_vm3, %v450_v44  ;;  %v3307_v44 = vld [vmem:[%s3151_s13 + $0x230] sm:$0xff] }
 0x189   : > { %2251 = vmatprep.mubr.msk.f32.mxu1 %vm371_vm3, %v451_v45  ;;  %2497 = vmatpush3.bf16.msra.mxu1 %v2494_v55  ;;  %v3314_v45 = vld [vmem:[%s3151_s13 + $0x238] sm:$0xff] }
 0x18a   : > { %2499 = vmatprep.subr.bf16.mxu1 %v2498_v58 }
 0x18c   : > { %2252 = vmatmul.mubr.msk.f32.gmra.mrb[8].mxu1 %vm371_vm3, %v452_v46  ;;  %v3317_v46 = vld [vmem:[%s3151_s13 + $0x240] sm:$0xff] }
 0x18d   : > { %2501 = vmatpush3.bf16.msra.mxu1 %v2498_v58 }
 0x243   : > { %v441_v61 = vpop.f32.mrb[0].mxu1 }
 0x244   : > { %v442_v62 = vadd.f32 %v1974_v60, %v441_v61  ;;  %v2225_v63 = vpop.f32.mrb[1].mxu1 }
 0x246   : > { %757 = vrot.lane.b32.xlu0 %v442_v62, %s2911_s25 }
 0x24a   : > { %1207 = vrot.lane.b32.xlu0 %v357_v31, %s2912_s22 }
 0x253   : > { %v2244_v1 = vpop.f32.mrb[2].mxu1 }
 0x254   : > { %v3220_v2 = vadd.f32 %v2244_v1, %v1976_v0  ;;  %v556_v3 = vpop.f32.mrb[3].mxu1 }
 0x255   : > { %v3222_v5 = vadd.f32 %v1976_v0, %v556_v3 }
 0x256   : > { %v596_v6 = vmax.f32 %v3220_v2, 0.0 }
 0x257   : > { %v595_v8 = vmax.f32 %v3222_v5, 0.0  ;;  %v2247_v9 = vpop.f32.mrb[4].mxu1 }
 0x258   : > { %v3226_v10 = vadd.f32 %v2247_v9, %v1976_v0  ;;  %v566_v11 = vpop.f32.mrb[5].mxu1 }
 0x259   : > { %v3228_v12 = vadd.f32 %v1976_v0, %v566_v11  ;;  %2270 = vmatprep.mubr.msk.f32.mxu1 %vm371_vm3, %v595_v8 }
 0x25a   : > { %v598_v13 = vmax.f32 %v3226_v10, 0.0  ;;  %2271 = vmatmul.mubr.msk.f32.vlgmr.msra.gmra.mrb[10].mxu1 %vm371_vm3, %v596_v6 }
 0x25b   : > { %v597_v14 = vmax.f32 %v3228_v12, 0.0  ;;  %v2250_v15 = vpop.f32.mrb[6].mxu1 }
 0x25c   : > { %v3238_v16 = vadd.f32 %v2250_v15, %v1976_v0  ;;  %v576_v18 = vpop.f32.mrb[7].mxu1 }
 0x25d   : > { %v3240_v19 = vadd.f32 %v1976_v0, %v576_v18  ;;  %2273 = vmatprep.mubr.msk.f32.mxu1 %vm371_vm3, %v597_v14 }
 0x25e   : > { %v600_v20 = vmax.f32 %v3238_v16, 0.0  ;;  %2274 = vmatmul.mubr.msk.f32.gmra.mrb[12].mxu1 %vm371_vm3, %v598_v13  ;;  %v1549_v16 = vld [vmem:[%s3151_s13 + $0x128] sm:$0xff] }
 0x25f   : > { %v599_v21 = vmax.f32 %v3240_v19, 0.0  ;;  %v2253_v22 = vpop.f32.mrb[8].mxu1  ;;  %v1550_v19 = vld [vmem:[%s3151_s13 + $0x130] sm:$0xff] }
 0x260   : > { %v3250_v23 = vadd.f32 %v2253_v22, %v1976_v0  ;;  %v586_v24 = vpop.f32.mrb[9].mxu1 }
 0x261   : > { %v3252_v25 = vadd.f32 %v1976_v0, %v586_v24  ;;  %2276 = vmatprep.mubr.msk.f32.mxu1 %vm371_vm3, %v599_v21 }
 0x262   : > { %v602_v26 = vmax.f32 %v3250_v23, 0.0  ;;  %2277 = vmatmul.mubr.msk.f32.gmra.mrb[14].mxu1 %vm371_vm3, %v600_v20  ;;  %v1553_v23 = vld [vmem:[%s3151_s13 + $0x148] sm:$0xff] }
 0x263   : > { %v601_v27 = vmax.f32 %v3252_v25, 0.0  ;;  %v1552_v25 = vld [vmem:[%s3151_s13 + $0x140] sm:$0xff] }
 0x265   : > { %2279 = vmatprep.mubr.msk.f32.mxu1 %vm371_vm3, %v601_v27 }
 0x266   : > { %2280 = vmatmul.mubr.msk.f32.gmra.mrb[16].mxu1 %vm371_vm3, %v602_v26 }
 0x267   : > { %2287 = vmatprep.mubr.msk.f32.mxu1 %vm760_vm4, %v750_v28 }
 0x2b8   : > { %v758_v31 = vpop.permute.xlu0 %757 }
 0x2b9   : > { %2282 = vmatprep.subr.mxu0 %v758_v31  ;;  %2576 = vmatprep.subr.mxu1 %v758_v31 }
 0x2ba   : > { %2283 = vmatpush3.msra.mxu0 %v758_v31  ;;  %2577 = vmatpush3.msra.mxu1 %v758_v31 }
 0x2bb   : > { %2285 = vmatmul.mubr.msk.f32.vlgmr.msra.gmra.mrb[2].mxu0 %vm760_vm4, %v749_v32  ;;  %2288 = vmatmul.mubr.msk.f32.vlgmr.msra.gmra.mrb[12].mxu1 %vm760_vm4, %v751_v33 }
 0x2bc   : > { %2296 = vmatprep.subr.mxu1 %v442_v62  ;;  %2503 = vmatprep.subr.bf16.mxu0 %v2502_v34  ;;  %v3277_v36 = vpop.permute.xlu0 %1207 }
 0x2bd   : > { %2505 = vmatpush3.bf16.msra.mxu0 %v2502_v34  ;;  %2297 = vmatpush3.msra.mxu1 %v442_v62 }
 0x2be   : > { %2326 = vmatprep.subr.mxu0 %v3277_v36  ;;  %2290 = vmatprep.mubr.msk.f32.mxu1 %vm760_vm4, %v752_v35 }
 0x2bf   : > { %2291 = vmatmul.mubr.msk.f32.gmra.mrb[14].mxu1 %vm760_vm4, %v753_v37  ;;  %2522 = vmatprep.subr.bf16.mxu1 %v2908_v4 }
 0x2c0   : > { %2293 = vmatprep.mubr.msk.f32.mxu1 %vm760_vm4, %v754_v38 }
 0x2c3   : > { %2294 = vmatmul.mubr.msk.f32.gmra.mrb[16].mxu1 %vm760_vm4, %v755_v39 }
 0x2c4   : > { %2298 = vmatprep.mubr.msk.f32.mxu1 %vm760_vm4, %v3288_v40 }
 0x2c7   : > { %2299 = vmatmul.mubr.msk.f32.vlgmr.msra.gmra.mrb[18].mxu1 %vm760_vm4, %v3294_v41 }
 0x2c8   : > { %2301 = vmatprep.mubr.msk.f32.mxu1 %vm760_vm4, %v3297_v42 }
 0x2cb   : > { %2302 = vmatmul.mubr.msk.f32.gmra.mrb[12].mxu1 %vm760_vm4, %v3304_v43 }
 0x2cc   : > { %2304 = vmatprep.mubr.msk.f32.mxu1 %vm760_vm4, %v3307_v44 }
 0x2cf   : > { %2305 = vmatmul.mubr.msk.f32.gmra.mrb[14].mxu1 %vm760_vm4, %v3314_v45 }
 0x2d0   : > { %2307 = vmatprep.mubr.msk.f32.mxu1 %vm760_vm4, %v3317_v46 }
 0x2d3   : > { %2308 = vmatmul.mubr.msk.f32.gmra.mrb[16].mxu1 %vm760_vm4, %v3324_v47 }
 0x2d4   : > { %2384 = vmatprep.mubr.msk.f32.mxu1 %vm2909_vm1, %v2910_v7 }
 0x32d   : > { %v2272_v48 = vpop.f32.mrb[10].mxu1 }
 0x32e   : > { %v701_v49 = vpop.f32.mrb[11].mxu1 }
 0x38e   : > { %v2286_v50 = vpop.f32.mrb[2].mxu0 }
 0x38f   : > { %v2578_v51 = vadd.f32 %v2286_v50, %v2272_v48  ;;  %v851_v52 = vpop.f32.mrb[3].mxu0 }
 0x390   : > { %v2580_v53 = vadd.f32 %v851_v52, %v701_v49 }
 0x39a   : > { %v2300_v54 = vpop.f32.mrb[18].mxu1 }
 0x39b   : > { %v2579_v55 = vadd.f32 %v2578_v51, %v2300_v54  ;;  %v980_v56 = vpop.f32.mrb[19].mxu1 }
 0x39c   : > { %v2581_v57 = vadd.f32 %v2580_v53, %v980_v56 }
 0x39d   : > { %v2010_v58 = vmul.f32 -1.442695, %v2579_v55 }
 0x39e   : > { %v2009_v59 = vmul.f32 -1.442695, %v2581_v57  ;;  %v2303_v60 = vpop.f32.mrb[12].mxu1 }
 0x39f   : > { %2676 = vpow2.f32 %v2010_v58  ;;  %v2012_v61 = vmul.f32 -1.442695, %v2303_v60  ;;  %v990_v62 = vpop.f32.mrb[13].mxu1 }
 0x3a0   : > { %2678 = vpow2.f32 %v2009_v59  ;;  %v2011_v63 = vmul.f32 -1.442695, %v990_v62  ;;  %v1330_v62 = vld [vmem:[%s3151_s13 + $0x118] sm:$0xff] }
 0x3a1   : > { %2680 = vpow2.f32 %v2012_v61 }
 0x3a2   : > { %2682 = vpow2.f32 %v2011_v63  ;;  %v2306_v0 = vpop.f32.mrb[14].mxu1 }
 0x3a3   : > { %v2014_v1 = vmul.f32 -1.442695, %v2306_v0  ;;  %v1000_v3 = vpop.f32.mrb[15].mxu1 }
 0x3a4   : > { %v2013_v9 = vmul.f32 -1.442695, %v1000_v3 }
 0x3a5   : > { %2684 = vpow2.f32 %v2014_v1 }
 0x3a6   : > { %2686 = vpow2.f32 %v2013_v9  ;;  %v2309_v11 = vpop.f32.mrb[16].mxu1 }
 0x3a7   : > { %v2016_v15 = vmul.f32 -1.442695, %v2309_v11  ;;  %v1010_v18 = vpop.f32.mrb[17].mxu1 }
 0x3a8   : > { %v2015_v22 = vmul.f32 -1.442695, %v1010_v18 }
 0x3a9   : > { %v2677_v24 = vpop.eup %2676  ;;  %2688 = vpow2.f32 %v2016_v15 }
 0x3aa   : > { %v2679_v28 = vpop.eup %2678  ;;  %v1052_v29 = vadd.f32 1.0, %v2677_v24  ;;  %2690 = vpow2.f32 %v2015_v22 }
 0x3ab   : > { %v2681_v30 = vpop.eup %2680  ;;  %v1051_v31 = vadd.f32 1.0, %v2679_v28 }
 0x3ac   : > { %v2683_v32 = vpop.eup %2682  ;;  %v1054_v34 = vadd.f32 1.0, %v2681_v30 }
 0x3ad   : > { %2692 = vrcp.f32 %v1051_v31  ;;  %v1053_v33 = vadd.f32 1.0, %v2683_v32 }
 0x3ae   : > { %2694 = vrcp.f32 %v1052_v29 }
 0x3af   : > { %v2685_v35 = vpop.eup %2684  ;;  %2696 = vrcp.f32 %v1053_v33 }
 0x3b0   : > { %v2687_v37 = vpop.eup %2686  ;;  %2698 = vrcp.f32 %v1054_v34  ;;  %v1056_v39 = vadd.f32 1.0, %v2685_v35 }
 0x3b1   : > { %v1055_v38 = vadd.f32 1.0, %v2687_v37 }
 0x3b3   : > { %v2689_v48 = vpop.eup %2688  ;;  %2700 = vrcp.f32 %v1055_v38 }
 0x3b4   : > { %v2691_v49 = vpop.eup %2690  ;;  %2702 = vrcp.f32 %v1056_v39  ;;  %v1058_v51 = vadd.f32 1.0, %v2689_v48 }
 0x3b5   : > { %v1057_v50 = vadd.f32 1.0, %v2691_v49 }
 0x3b7   : > { %v2693_v52 = vpop.eup %2692  ;;  %2704 = vrcp.f32 %v1057_v50 }
 0x3b8   : > { %v2695_v53 = vpop.eup %2694  ;;  %2314 = vmatprep.mubr.msk.f32.mxu0 %vm1077_vm5, %v2693_v52  ;;  %2706 = vrcp.f32 %v1058_v51 }
 0x3b9   : > { %v2697_v54 = vpop.eup %2696  ;;  %2315 = vmatmul.mubr.msk.f32.vlgmr.msra.gmra.mrb[4].mxu0 %vm1077_vm5, %v2695_v53 }
 0x3ba   : > { %2327 = vmatpush3.msra.mxu0 %v3277_v36  ;;  %2317 = vmatprep.mubr.msk.f32.mxu0 %vm1077_vm5, %v2697_v54  ;;  %v2699_v55 = vpop.eup %2698  ;;  %v1323_v36 = vld [vmem:[%s3151_s13 + $0xe0] sm:$0xff] }
 0x3bd   : > { %v2701_v56 = vpop.eup %2700  ;;  %2318 = vmatmul.mubr.msk.f32.gmra.mrb[6].mxu0 %vm1077_vm5, %v2699_v55 }
 0x3be   : > { %2320 = vmatprep.mubr.msk.f32.mxu0 %vm1077_vm5, %v2701_v56  ;;  %v2703_v57 = vpop.eup %2702 }
 0x3c1   : > { %v2705_v58 = vpop.eup %2704  ;;  %2321 = vmatmul.mubr.msk.f32.gmra.mrb[8].mxu0 %vm1077_vm5, %v2703_v57 }
 0x3c2   : > { %2323 = vmatprep.mubr.msk.f32.mxu0 %vm1077_vm5, %v2705_v58  ;;  %v2707_v59 = vpop.eup %2706 }
 0x3c5   : > { %2324 = vmatmul.mubr.msk.f32.gmra.mrb[10].mxu0 %vm1077_vm5, %v2707_v59 }
 0x3c6   : > { %2328 = vmatprep.mubr.msk.f32.mxu0 %vm760_vm4, %v3288_v40  ;;  %v1324_v40 = vld [vmem:[%s3151_s13 + $0xe8] sm:$0xff] }
 0x3c9   : > { %2329 = vmatmul.mubr.msk.f32.vlgmr.msra.gmra.mrb[12].mxu0 %vm760_vm4, %v3294_v41  ;;  %v2506_v41 = vpack.c.bf16 %v1324_v40, %v1323_v36 }
 0x3ca   : > { %2331 = vmatprep.mubr.msk.f32.mxu0 %vm760_vm4, %v3297_v42  ;;  %v1325_v42 = vld [vmem:[%s3151_s13 + $0xf0] sm:$0xff] }
 0x3cb   : > { %2507 = vmatprep.subr.bf16.mxu0 %v2506_v41 }
 0x3cc   : > { %2509 = vmatpush3.bf16.msra.mxu0 %v2506_v41 }
 0x3cd   : > { %2332 = vmatmul.mubr.msk.f32.gmra.mrb[14].mxu0 %vm760_vm4, %v3304_v43  ;;  %v1326_v43 = vld [vmem:[%s3151_s13 + $0xf8] sm:$0xff] }
 0x3ce   : > { %2334 = vmatprep.mubr.msk.f32.mxu0 %vm760_vm4, %v3307_v44  ;;  %v2510_v60 = vpack.c.bf16 %v1326_v43, %v1325_v42  ;;  %v1327_v44 = vld [vmem:[%s3151_s13 + $0x100] sm:$0xff] }
 0x3d0   : > { %2511 = vmatprep.subr.bf16.mxu0 %v2510_v60 }
 0x3d1   : > { %2335 = vmatmul.mubr.msk.f32.gmra.mrb[16].mxu0 %vm760_vm4, %v3314_v45  ;;  %v1328_v45 = vld [vmem:[%s3151_s13 + $0x108] sm:$0xff] }
 0x3d2   : > { %2337 = vmatprep.mubr.msk.f32.mxu0 %vm760_vm4, %v3317_v46  ;;  %2513 = vmatpush3.bf16.msra.mxu0 %v2510_v60  ;;  %v2514_v61 = vpack.c.bf16 %v1328_v45, %v1327_v44  ;;  %v1329_v46 = vld [vmem:[%s3151_s13 + $0x110] sm:$0xff] }
 0x3d4   : > { %2515 = vmatprep.subr.bf16.mxu0 %v2514_v61 }
 0x3d5   : > { %2338 = vmatmul.mubr.msk.f32.gmra.mrb[18].mxu0 %vm760_vm4, %v3324_v47  ;;  %v2518_v47 = vpack.c.bf16 %v1330_v62, %v1329_v46 }
 0x3d6   : > { %2517 = vmatpush3.bf16.msra.mxu0 %v2514_v61 }
 0x3d7   : > { %2519 = vmatprep.subr.bf16.mxu0 %v2518_v47 }
 0x3da   : > { %2521 = vmatpush3.bf16.msra.mxu0 %v2518_v47 }
 0x3db   : > { %2534 = vmatprep.subr.bf16.mxu0 %v2908_v4 }
 0x48c   : > { %v2316_v63 = vpop.f32.mrb[4].mxu0 }
 0x48d   : > { %v1168_v0 = vpop.f32.mrb[5].mxu0 }
 0x490   : > { %v2319_v1 = vpop.f32.mrb[6].mxu0 }
 0x491   : > { %v1178_v3 = vpop.f32.mrb[7].mxu0 }
 0x494   : > { %v3364_v9 = vpop.f32.mrb[8].mxu0 }
 0x495   : > { %v3366_v11 = vpop.f32.mrb[9].mxu0 }
 0x498   : > { %v3368_v15 = vpop.f32.mrb[10].mxu0 }
 0x499   : > { %v3370_v18 = vpop.f32.mrb[11].mxu0 }
 0x49c   : > { %v2330_v22 = vpop.f32.mrb[12].mxu0 }
 0x49d   : > { %v1276_v24 = vpop.f32.mrb[13].mxu0  ;;  %v1316_v29 = vmul.f32 %v2330_v22, %v596_v6  ;;  %v2043_v22 = vld [vmem:[%s3157_s15 + $0x4] ss:$0 sm:$0xff] }
 0x49e   : > { %v1315_v28 = vmul.f32 %v1276_v24, %v595_v8 }
 0x4a0   : > { %v2333_v30 = vpop.f32.mrb[14].mxu0  ;;  %2356 = vmatprep.mubr.msk.f32.mxu0 %vm371_vm3, %v1315_v28 }
 0x4a1   : > { %v1286_v31 = vpop.f32.mrb[15].mxu0  ;;  %2357 = vmatmul.mubr.msk.f32.vlgmr.msra.gmra.mrb[20].mxu0 %vm371_vm3, %v1316_v29  ;;  %v1318_v33 = vmul.f32 %v2333_v30, %v598_v13 }
 0x4a2   : > { %v1317_v32 = vmul.f32 %v1286_v31, %v597_v14  ;;  %v1548_v14 = vld [vmem:[%s3151_s13 + $0x120] sm:$0xff] }
 0x4a4   : > { %v2336_v34 = vpop.f32.mrb[16].mxu0  ;;  %2359 = vmatprep.mubr.msk.f32.mxu0 %vm371_vm3, %v1317_v32 }
 0x4a5   : > { %v1296_v2 = vpop.f32.mrb[17].mxu0  ;;  %2360 = vmatmul.mubr.msk.f32.gmra.mrb[22].mxu0 %vm371_vm3, %v1318_v33  ;;  %v1320_v6 = vmul.f32 %v2336_v34, %v600_v20  ;;  %v2535_v20 = vpack.c.bf16 %v1549_v16, %v1548_v14  ;;  %v1745_v14 = vld [vmem:[%s3151_s13 + $0x188] sm:$0xff]  ;;  %v1746_v16 = vld [vmem:[%s3151_s13 + $0x190] sm:$0xff] }
 0x4a6   : > { %v1319_v5 = vmul.f32 %v1296_v2, %v599_v21  ;;  %v1551_v21 = vld [vmem:[%s3151_s13 + $0x138] sm:$0xff] }
 0x4a7   : > { %2536 = vmatpush3.bf16.msra.mxu0 %v2535_v20  ;;  %v2538_v35 = vpack.c.bf16 %v1551_v21, %v1550_v19  ;;  %v1747_v20 = vld [vmem:[%s3151_s13 + $0x198] sm:$0xff] }
 0x4a8   : > { %v2339_v8 = vpop.f32.mrb[18].mxu0  ;;  %2362 = vmatprep.mubr.msk.f32.mxu0 %vm371_vm3, %v1319_v5  ;;  %2537 = vmatprep.subr.bf16.mxu0 %v2908_v4  ;;  %v1661_v5 = vld [vmem:[%s3151_s13 + $0x160] sm:$0xff]  ;;  %v2556_v21 = vpack.c.bf16 %v1747_v20, %v1746_v16 }
 0x4a9   : > { %v1306_v10 = vpop.f32.mrb[19].mxu0  ;;  %2363 = vmatmul.mubr.msk.f32.gmra.mrb[24].mxu0 %vm371_vm3, %v1320_v6  ;;  %v1322_v13 = vmul.f32 %v2339_v8, %v602_v26  ;;  %v2541_v26 = vpack.c.bf16 %v1553_v23, %v1552_v25  ;;  %v1662_v6 = vld [vmem:[%s3151_s13 + $0x168] sm:$0xff] }
 0x4aa   : > { %v1321_v12 = vmul.f32 %v1306_v10, %v601_v27  ;;  %v2033_v27 = vld [vmem:[%s3157_s15 + $0x3] ss:$0 sm:$0xff]  ;;  %v2547_v8 = vpack.c.bf16 %v1662_v6, %v1661_v5  ;;  %v1664_v10 = vld [vmem:[%s3151_s13 + $0x178] sm:$0xff] }
 0x4ab   : > { %2539 = vmatpush3.bf16.msra.mxu0 %v2538_v35  ;;  %v1748_v35 = vld [vmem:[%s3151_s13 + $0x1a0] sm:$0xff]  ;;  %v1749_v25 = vld [vmem:[%s3151_s13 + $0x1a8] sm:$0xff] }
 0x4ac   : > { %2365 = vmatprep.mubr.msk.f32.mxu0 %vm371_vm3, %v1321_v12  ;;  %2540 = vmatprep.subr.bf16.mxu0 %v2908_v4  ;;  %v2559_v23 = vpack.c.bf16 %v1749_v25, %v1748_v35 }
 0x4ad   : > { %2366 = vmatmul.mubr.msk.f32.gmra.mrb[26].mxu0 %vm371_vm3, %v1322_v13  ;;  %v1744_v13 = vld [vmem:[%s3151_s13 + $0x180] sm:$0xff] }
 0x4ae   : > { %2403 = vmatprep.mubr.msk.f32.mxu0 %vm2909_vm1, %v2910_v7  ;;  %v2553_v19 = vpack.c.bf16 %v1745_v14, %v1744_v13 }
 0x4af   : > { %2542 = vmatpush3.bf16.msra.mxu0 %v2541_v26  ;;  %v1750_v26 = vld [vmem:[%s3151_s13 + $0x1b0] sm:$0xff] }
 0x4b0   : > { %2543 = vmatprep.subr.bf16.mxu0 %v2908_v4 }
 0x574   : > { %v2358_v37 = vpop.f32.mrb[20].mxu0 }
 0x575   : > { %v1432_v38 = vadd.f32 %v2358_v37, %v2033_v27  ;;  %v1426_v39 = vpop.f32.mrb[21].mxu0 }
 0x576   : > { %v1427_v48 = vadd.f32 %v2033_v27, %v1426_v39  ;;  %v1753_v39 = vld [vmem:[%s3151_s13 + $0x1c8] sm:$0xff] }
 0x577   : > { %v1467_v49 = vmul.f32 %v2316_v63, %v1432_v38  ;;  %v1752_v38 = vld [vmem:[%s3151_s13 + $0x1c0] sm:$0xff] }
 0x578   : > { %v1466_v50 = vmul.f32 %v1427_v48, %v1168_v0  ;;  %v2361_v51 = vpop.f32.mrb[22].mxu0  ;;  %v1465_v0 = vld [vmem:[%s3151_s13 + $0x290] sm:$0xff]  ;;  %v2565_v48 = vpack.c.bf16 %v1753_v39, %v1752_v38 }
 0x579   : > { %v1442_v52 = vadd.f32 %v2361_v51, %v2033_v27  ;;  %v1436_v53 = vpop.f32.mrb[23].mxu0 }
 0x57a   : > { %v2523_v54 = vpack.c.bf16 %v1467_v49, %v1466_v50  ;;  %v1437_v55 = vadd.f32 %v2033_v27, %v1436_v53  ;;  %v1754_v49 = vld [vmem:[%s3151_s13 + $0x1d0] sm:$0xff]  ;;  %v1755_v50 = vld [vmem:[%s3151_s13 + $0x1d8] sm:$0xff]  ;;  %v1757_v53 = vld [vmem:[%s3151_s13 + $0x1e8] sm:$0xff] }
 0x57b   : > { %v1469_v56 = vmul.f32 %v2319_v1, %v1442_v52  ;;  %v1554_v1 = vld [vmem:[%s3151_s13 + $0x150] sm:$0xff]  ;;  %v2568_v51 = vpack.c.bf16 %v1755_v50, %v1754_v49  ;;  %v1756_v52 = vld [vmem:[%s3151_s13 + $0x1e0] sm:$0xff] }
 0x57c   : > { %v1468_v57 = vmul.f32 %v1437_v55, %v1178_v3  ;;  %v2364_v58 = vpop.f32.mrb[24].mxu0  ;;  %2524 = vmatpush3.bf16.msra.mxu1 %v2523_v54  ;;  %v1555_v3 = vld [vmem:[%s3151_s13 + $0x158] sm:$0xff]  ;;  %v2571_v54 = vpack.c.bf16 %v1757_v53, %v1756_v52 }
 0x57d   : > { %v1452_v59 = vadd.f32 %v2364_v58, %v2033_v27  ;;  %v1446_v36 = vpop.f32.mrb[25].mxu0  ;;  %2525 = vmatprep.subr.bf16.mxu1 %v2908_v4 }
 0x57e   : > { %v2526_v40 = vpack.c.bf16 %v1469_v56, %v1468_v57  ;;  %v1447_v41 = vadd.f32 %v2033_v27, %v1446_v36 }
 0x57f   : > { %v1471_v42 = vmul.f32 %v3364_v9, %v1452_v59  ;;  %v2544_v9 = vpack.c.bf16 %v1555_v3, %v1554_v1  ;;  %v2045_v59 = vld [vmem:[%s3157_s15 + $0x5] ss:$0 sm:$0xff] }
 0x580   : > { %v1470_v43 = vmul.f32 %v1447_v41, %v3366_v11  ;;  %v2367_v60 = vpop.f32.mrb[26].mxu0  ;;  %2527 = vmatpush3.bf16.msra.mxu1 %v2526_v40  ;;  %v2046_v40 = vld [vmem:[%s3157_s15 + $0x6] ss:$0 sm:$0xff] }
 0x581   : > { %v1462_v44 = vadd.f32 %v2367_v60, %v2033_v27  ;;  %v1456_v45 = vpop.f32.mrb[27].mxu0  ;;  %2528 = vmatprep.subr.bf16.mxu1 %v2908_v4  ;;  %2545 = vmatpush3.bf16.msra.mxu0 %v2544_v9  ;;  %v1759_v60 = vld [vmem:[%s3151_s13 + $0x1f8] sm:$0xff] }
 0x582   : > { %v2529_v61 = vpack.c.bf16 %v1471_v42, %v1470_v43  ;;  %v1457_v46 = vadd.f32 %v2033_v27, %v1456_v45  ;;  %2552 = vmatprep.subr.bf16.mxu0 %v2908_v4  ;;  %v1751_v27 = vld [vmem:[%s3151_s13 + $0x1b8] sm:$0xff]  ;;  %v1758_v43 = vld [vmem:[%s3151_s13 + $0x1f0] sm:$0xff] }
 0x583   : > { %v1473_v62 = vmul.f32 %v3368_v15, %v1462_v44  ;;  %v2562_v37 = vpack.c.bf16 %v1751_v27, %v1750_v26  ;;  %v2574_v44 = vpack.c.bf16 %v1759_v60, %v1758_v43  ;;  %v2047_v45 = vld [vmem:[%s3157_s15 + $0x7] ss:$0 sm:$0xff] }
 0x584   : > { %v1472_v47 = vmul.f32 %v1457_v46, %v3370_v18  ;;  %2530 = vmatpush3.bf16.msra.mxu1 %v2529_v61 }
 0x585   : > { %2531 = vmatprep.subr.bf16.mxu1 %v2908_v4 }
 0x586   : > { %v2532_v63 = vpack.c.bf16 %v1473_v62, %v1472_v47  ;;  %v2049_v47 = vld [vmem:[%s3157_s15 + $0x8] ss:$0 sm:$0xff] }
 0x588   : > { %2533 = vmatpush3.bf16.msra.mxu1 %v2532_v63 }
 0x589   : > { %2546 = vmatprep.subr.bf16.mxu1 %v2908_v4 }
 0x58b   : > { %2385 = vmatmul.mubr.msk.f32.vlgmr.msra.gmra.mrb[20].mxu1 %vm371_vm3, %v1465_v0 }
 0x58c   : > { %2414 = vmatprep.mubr.msk.f32.mxu1 %vm2909_vm1, %v2910_v7  ;;  %2548 = vmatpush3.bf16.msra.mxu1 %v2547_v8 }
 0x58d   : > { %2549 = vmatprep.subr.bf16.mxu1 %v2908_v4 }
 0x65e   : > { %v1543_v11 = vpop.f32.mrb[20].mxu1 }
 0x65f   : > { %v1547_v15 = vmax.f32 %v1543_v11, 0.0  ;;  %v2386_v18 = vpop.f32.mrb[21].mxu1 }
 0x661   : > { %2404 = vmatmul.mubr.msk.f32.vlgmr.msra.gmra.mrb[28].mxu0 %vm371_vm3, %v1547_v15 }
 0x662   : > { %2449 = vmatprep.mubr.msk.f32.mxu0 %vm2909_vm1, %v2910_v7  ;;  %2554 = vmatpush3.bf16.msra.mxu0 %v2553_v19 }
 0x663   : > { %2555 = vmatprep.subr.bf16.mxu0 %v2908_v4 }
 0x666   : > { %2557 = vmatpush3.bf16.msra.mxu0 %v2556_v21 }
 0x667   : > { %2558 = vmatprep.subr.bf16.mxu0 %v2908_v4 }
 0x66a   : > { %2560 = vmatpush3.bf16.msra.mxu0 %v2559_v23 }
 0x66b   : > { %2561 = vmatprep.subr.bf16.mxu0 %v2908_v4 }
 0x66e   : > { %2563 = vmatpush3.bf16.msra.mxu0 %v2562_v37 }
 0x66f   : > { %2564 = vmatprep.subr.bf16.mxu0 %v2908_v4 }
 0x672   : > { %2566 = vmatpush3.bf16.msra.mxu0 %v2565_v48 }
 0x673   : > { %2567 = vmatprep.subr.bf16.mxu0 %v2908_v4 }
 0x676   : > { %2569 = vmatpush3.bf16.msra.mxu0 %v2568_v51 }
 0x677   : > { %2570 = vmatprep.subr.bf16.mxu0 %v2908_v4 }
 0x67a   : > { %2572 = vmatpush3.bf16.msra.mxu0 %v2571_v54 }
 0x67b   : > { %2573 = vmatprep.subr.bf16.mxu0 %v2908_v4 }
 0x67e   : > { %2575 = vmatpush3.bf16.msra.mxu0 %v2574_v44 }
 0x734   : > { %v1630_v24 = vpop.f32.mrb[28].mxu0 }
 0x735   : > { %v1631_v28 = vadd.f32 %v2043_v22, %v1630_v24  ;;  %v2405_v29 = vpop.f32.mrb[29].mxu0 }
 0x737   : > { %v1634_v30 = vadd.f32 %v1631_v28, %v3179_v17  ;;  %v1663_v17 = vld [vmem:[%s3151_s13 + $0x170] sm:$0xff] }
 0x738   : > { %v2550_v12 = vpack.c.bf16 %v1664_v10, %v1663_v17 }
 0x739   : > { %v1637_v31 = vsel %vm283_vm2, %v1634_v30, 0.0 }
 0x73a   : > { %1638 = vadd.xlane.f32.xlu1 %v1637_v31  ;;  %2551 = vmatpush3.bf16.msra.mxu1 %v2550_v12 }
 0x7c7   : > { %v1639_v32 = vpop.xlane.xlu1 %1638 }
 0x7c8   : > { %v1641_v33 = vmul.f32 0.03125, %v1639_v32  ;;  %v2050_v32 = vld [vmem:[%s3157_s15 + $0x9] ss:$0 sm:$0xff] }
 0x7ca   : > { %v1642_v34 = vsub.f32 %v1634_v30, %v1641_v33 }
 0x7cc   : > { %v1643_v2 = vmul.f32 %v1642_v34, %v1642_v34 }
 0x7ce   : > { %v1644_v7 = vsel %vm283_vm2, %v1643_v2, 0.0 }
 0x7cf   : > { %1645 = vadd.xlane.f32.xlu1 %v1644_v7 }
 0x85c   : > { %v1646_v55 = vpop.xlane.xlu1 %1645 }
 0x85d   : > { %v1647_v56 = vmul.f32 0.03125, %v1646_v55 }
 0x85f   : > { %v1648_v57 = vadd.f32 1e-05, %v1647_v56 }
 0x861   : > { %2708 = vrsqrt.f32 %v1648_v57 }
 0x86b   : > { %v2709_v58 = vpop.eup %2708 }
 0x86c   : > { %v1650_v36 = vmul.f32 %v2709_v58, %v1642_v34  ;;  %v2051_v34 = vld [vmem:[%s3157_s15 + $0xa] ss:$0 sm:$0xff] }
 0x86e   : > { %v1655_v41 = vmul.f32 %v2045_v59, %v1650_v36 }
 0x870   : > { %v1660_v42 = vadd.f32 %v2046_v40, %v1655_v41 }
 0x872   : > { %2415 = vmatmul.mubr.msk.f32.vlgmr.msra.gmra.mrb[22].mxu1 %vm283_vm2, %v1660_v42 }
 0x945   : > { %v1739_v4 = vpop.f32.mrb[22].mxu1 }
 0x946   : > { %v1740_v61 = vadd.f32 %v2047_v45, %v1739_v4  ;;  %v2416_v46 = vpop.f32.mrb[23].mxu1 }
 0x948   : > { %v1743_v62 = vmax.f32 %v1740_v61, 0.0 }
 0x94a   : > { %2450 = vmatmul.mubr.f32.vlgmr.msra.gmra.mrb[30].mxu0 %v1743_v62 }
 0xa1d   : > { %v1831_v63 = vpop.f32.mrb[30].mxu0 }
 0xa1e   : > { %v1832_v0 = vadd.f32 %v2049_v47, %v1831_v63  ;;  %v2451_v1 = vpop.f32.mrb[31].mxu0 }
 0xa20   : > { %v1835_v3 = vadd.f32 %v1832_v0, %v1660_v42 }
 0xa22   : > { %v1838_v9 = vsel %vm283_vm2, %v1835_v3, 0.0 }
 0xa23   : > { %1839 = vadd.xlane.f32.xlu0 %v1838_v9 }
 0xab0   : > { %v1840_v11 = vpop.xlane.xlu0 %1839 }
 0xab1   : > { %v1841_v15 = vmul.f32 0.03125, %v1840_v11 }
 0xab3   : > { %v1842_v18 = vsub.f32 %v1835_v3, %v1841_v15 }
 0xab5   : > { %v1843_v22 = vmul.f32 %v1842_v18, %v1842_v18 }
 0xab7   : > { %v1844_v24 = vsel %vm283_vm2, %v1843_v22, 0.0 }
 0xab8   : > { %1845 = vadd.xlane.f32.xlu1 %v1844_v24 }
 0xb45   : > { %v1846_v28 = vpop.xlane.xlu1 %1845 }
 0xb46   : > { %v1847_v29 = vmul.f32 0.03125, %v1846_v28 }
 0xb48   : > { %v1848_v30 = vadd.f32 1e-05, %v1847_v29 }
 0xb4a   : > { %2710 = vrsqrt.f32 %v1848_v30 }
 0xb54   : > { %v2711_v31 = vpop.eup %2710 }
 0xb55   : > { %v1850_v33 = vmul.f32 %v2711_v31, %v1842_v18 }
 0xb57   : > { %v1855_v2 = vmul.f32 %v2050_v32, %v1850_v33 }
 0xb59   : > { %v1860_v7 = vadd.f32 %v2051_v34, %v1855_v2 }
 0xb5b   : > { %1861 = vst.msk [vmem:[#allocation9] sm:$0xff] %vm283_vm2, %v1860_v7 }
 0xb5c   : > { %2841 = shalt.err (!%p2838_p9)
}
 0xb5d   : > { %s2842_s5 = scalar_lea.hbm %s3508_s4, 128 }
 0xb5e   : > { %p2843_p13 = scmp.ne.s32.totalorder %s3508_s4, %s2842_s5  ;;  %p2848_p3 = scmp.lt.u32.totalorder %s2842_s5, %s3508_s4 }
 0xb60   : > { %p2844_p10 = pnand %p2843_p13, %p2632_p2 }
 0xb62   : > { %p2845_p1 = pneg %p2844_p10 }
 0xb64   : > { %p2850_p8 = pnand %p2848_p3, %p2845_p1 }
 0xb66   : > { %2853 = shalt.err (!%p2850_p8)
}
 0xb67   : > { %2610 = dma.vmem_to_hbm [thread:$0]  (%p2632_p2), %s1870_s24, 128, %s3508_s4, [#allocation4]  }
 0xb68   : > { %2883 = dma.done.wait (%p2632_p2), [#allocation4], 128  }
 0xb69   : > { %2885 = vsyncadd (%p2632_p2), [#allocation4], 4294967168 }
 0xb6a PF: > { %p14_p6 = scmp.ge.s32.totalorder %s2961_s20, 4   ;;  %s3529_s15 = smov %s2892_s16 }
 0xb6b   : > { %s3530_s16 = smov %s2896_s17  ;;  %s3531_s17 = smov %s2971_s23 }
 0xb6c   : > { %s3532_s18 = smov %s2961_s20  ;;  %16 = sbr.rel (!%p14_p6) target bundleno = 4 (0x4), region = 95 }
 0xb73   :  { %1882 = vsyncpa [#allocation3], 1 }
 0xb74   :  { %1884 = vsyncpa [#allocation3 + $0x1], 1 }
 0xb75   :  { %1885 = vsyncpa [#allocation6], 1 }
 0xb76   :  { %1886 = vsyncpa [#allocation4], 1 }
 0xb77   :  { %1888 = vsyncpa [#allocation4 + $0x1], 1 }

</bundles_post_ra>
